<compile_context>
chip_gen: v5e
topology: v5e:2x2
jax: 0.10.0
libtpu: 0.0.40
codegen_flags: <defaults>
</compile_context>

<pallas_src>
import functools
import math

import jax
import jax.numpy as jnp
import numpy as np
from jax import lax
from jax.experimental import pallas as pl
from jax.experimental.pallas import tpu as pltpu

KERNEL_SIZE = 7
PAD = KERNEL_SIZE // 2


def _spatial_attention_kernel(w_ref, mask_ref, x_ref, o_ref, feat_ref, *, width):
    """w_ref    : (2*K*K,) f32 SMEM   flattened OIHW Conv2d(2,1,7,bias=False) weight.
    mask_ref : (K, HW)   f32 VMEM   per-dx column-validity masks (kills wrap taps).
    x_ref    : (nb, C, HW) VMEM     lane-dense flattened input block.
    o_ref    : (nb, C, HW) VMEM     output block.
    feat_ref : (2, nb, L) f32 VMEM  zero-padded flat [avg, max] feature planes.
    """
    nb, C, HW = o_ref.shape
    K = KERNEL_SIZE
    KK = K * K
    W = width

    # Plane data lives at 128-aligned lane offset D of each (L,) row; the zero
    # lanes before/after provide the conv's *vertical* zero padding.
    D = ((PAD * W + PAD + 127) // 128) * 128
    base = D - PAD * W - PAD                       # flat start of tap (dy=0, dx=0)

    # ---- channel mean / max (temporaries die before the conv loop) ----------
    xb = x_ref[...]                                            # native dtype
    avg = jnp.sum(xb.astype(jnp.float32), axis=1) * (1.0 / C)  # (nb, HW) f32
    mx = jnp.max(xb, axis=1).astype(jnp.float32)               # (nb, HW) f32

    # Zero the (tiny) scratch every step so the halo is correct regardless of
    # how the "parallel" axis is sharded across TensorCores, then store the
    # planes at the aligned interior offset.
    feat_ref[...] = jnp.zeros_like(feat_ref)
    feat_ref[0, :, pl.ds(D, HW)] = avg
    feat_ref[1, :, pl.ds(D, HW)] = mx

    # ---- 7x7 conv (2 planes -> 1) as 98 constant flat shifts ----------------
    # Each tap is a plain (misaligned) vld straight from the VMEM ref; the
    # per-dx column mask is applied once after accumulating over dy.
    acc = jnp.zeros((nb, HW), jnp.float32)
    for j in range(K):                             # dx
        part = jnp.zeros((nb, HW), jnp.float32)
        for i in range(K):                         # dy
            sl = feat_ref[:, :, pl.ds(base + i * W + j, HW)]   # (2, nb, HW)
            part = (part
                    + w_ref[i * K + j] * sl[0]
                    + w_ref[KK + i * K + j] * sl[1])
        cm = mask_ref[pl.ds(j, 1), :]              # (1, HW) 0/1 mask
        acc = acc + cm * part

    # sigmoid(z) = 0.5 * (1 + tanh(z/2)): tanh runs on the EUP, no VALU divide.
    att = 0.5 * jnp.tanh(0.5 * acc) + 0.5          # (nb, HW) f32
    att = att.astype(o_ref.dtype)                  # bf16 stays bf16 (v6e/v7x)

    # Re-read x in its native dtype only for the broadcast multiply: no f32
    # copy of the big block is held live across the 98-tap loop.
    o_ref[...] = (x_ref[...] * att[:, None, :]).astype(o_ref.dtype)


def spatial_attention(x, w):
    """x: (N, C, H, W).  w: (1, 2, K, K) f32 (OIHW).  Returns (N, C, H, W)."""
    N, C, H, W = x.shape
    HW = H * W
    K = KERNEL_SIZE

    w_flat = w.reshape(-1).astype(jnp.float32)                 # (2*K*K,)
    x_flat = x.reshape(N, C, HW)                               # free view of NCHW

    # Host-side per-dx column-validity masks for the flattened conv.
    col = np.arange(HW, dtype=np.int64) % W
    masks = np.stack(
        [((col >= PAD - j) & (col < W + PAD - j)).astype(np.float32)
         for j in range(K)], axis=0)                           # (K, HW)
    masks = jnp.asarray(masks)

    D = ((PAD * W + PAD + 127) // 128) * 128
    L = D + HW + PAD * W + PAD                                 # flat padded plane len

    # ---- block-size / VMEM budgeting (per-generation capacity aware) --------
    try:
        vmem_cap = int(pltpu.get_tpu_info().vmem_capacity_bytes)
    except Exception:
        vmem_cap = 128 * 2 ** 20
    budget = max(32 * 2 ** 20, min(int(0.80 * vmem_cap), 110 * 2 ** 20))

    itemsize = x.dtype.itemsize
    lane_pad = lambda n: ((n + 127) // 128) * 128
    # Per batch element per step: double-buffered in+out blocks, the transient
    # f32 reduce temp, the padded feature scratch and a few f32 plane temps.
    per_n = (2 * 2 * C * HW * itemsize
             + C * HW * 4
             + 2 * lane_pad(L) * 4
             + 16 * lane_pad(HW) * 4)
    target = 4 * 2 ** 20                                       # ~4 MiB per grid step
    nb = max(1, min(N, target // max(per_n, 1)))
    nb = min(nb, max(1, (budget * 7 // 10) // max(per_n, 1)))  # fit VMEM budget
    if N > 1:
        nb = min(nb, pl.cdiv(N, 2))   # >= 2 parallel steps so both v7x TCs get work
    nb = max(1, nb)
    # TODO(synk): add a C-tiling path (one accumulated pass over C for the two
    # feature planes, then a second tiled pass for the broadcast multiply) for
    # shapes where even a single-image block exceeds the v7x 64 MiB VMEM.

    grid_n = pl.cdiv(N, nb)
    kernel = functools.partial(_spatial_attention_kernel, width=W)

    out_flat = pl.pallas_call(
        kernel,
        out_shape=jax.ShapeDtypeStruct((N, C, HW), x.dtype),
        grid=(grid_n,),
        in_specs=[
            pl.BlockSpec(memory_space=pltpu.MemorySpace.SMEM),   # conv weights
            pl.BlockSpec((K, HW), lambda n: (0, 0)),             # column masks
            pl.BlockSpec((nb, C, HW), lambda n: (n, 0, 0)),      # x (lane-dense)
        ],
        out_specs=pl.BlockSpec((nb, C, HW), lambda n: (n, 0, 0)),
        scratch_shapes=[pltpu.VMEM((2, nb, L), jnp.float32)],
        compiler_params=pltpu.CompilerParams(
            dimension_semantics=("parallel",),
            vmem_limit_bytes=int(budget)),
    )(w_flat, masks, x_flat)

    return out_flat.reshape(N, C, H, W)


def spatial_attention_reference(x, w):
    """Pure-JAX reference matching the PyTorch module semantics."""
    avg = jnp.mean(x, axis=1, keepdims=True)
    mx = jnp.max(x, axis=1, keepdims=True)
    feat = jnp.concatenate([avg, mx], axis=1)                  # (N,2,H,W)
    conv = lax.conv_general_dilated(
        feat, w, window_strides=(1, 1), padding=((PAD, PAD), (PAD, PAD)),
        dimension_numbers=("NCHW", "OIHW", "NCHW"))
    return x * jax.nn.sigmoid(conv)


if __name__ == "__main__":
    key = jax.random.PRNGKey(0)
    kx, kw = jax.random.split(key)

    N, C, H, W = 2, 4, 16, 16
    x = jax.random.normal(kx, (N, C, H, W), dtype=jnp.float32)

    # Deterministic Conv2d(2, 1, 7, bias=False) weight (PyTorch-like uniform init).
    fan_in = 2 * KERNEL_SIZE * KERNEL_SIZE
    bound = 1.0 / math.sqrt(fan_in)
    w = jax.random.uniform(kw, (1, 2, KERNEL_SIZE, KERNEL_SIZE),
                           dtype=jnp.float32, minval=-bound, maxval=bound)

    out = spatial_attention(x, w)
    out = jax.block_until_ready(out)

    ref = jax.block_until_ready(spatial_attention_reference(x, w))
    np.testing.assert_allclose(np.asarray(out), np.asarray(ref),
                               rtol=1e-5, atol=1e-5)

    print("KERNEL_OK")
</pallas_src>

<mosaic_0001>
module attributes {stable_mosaic.version = 11 : i64} {
  func.func @_spatial_attention_kernel(%arg0: i32, %arg1: memref<98xf32, #tpu.memory_space<smem>>, %arg2: memref<7x256xf32, #tpu.memory_space<vmem>>, %arg3: memref<1x4x256xf32, #tpu.memory_space<vmem>>, %arg4: memref<1x4x256xf32, #tpu.memory_space<vmem>>, %arg5: memref<2x1x435xf32, #tpu.memory_space<vmem>>) attributes {dimension_semantics = [#tpu.dimension_semantics<parallel>], iteration_bounds = array<i64: 2>, scalar_prefetch = 0 : i64, scratch_operands = 1 : i64, tpu.core_type = #tpu.core_type<tc>, window_params = [{transform_indices = @transform_0, window_bounds = array<i64: 98>}, {pipeline_mode = #tpu.pipeline_mode<synchronous>, transform_indices = @transform_1, window_bounds = array<i64: 7, 256>}, {transform_indices = @transform_2, window_bounds = array<i64: 1, 4, 256>}, {transform_indices = @transform_3, window_bounds = array<i64: 1, 4, 256>}]} {
    %c0 = arith.constant 0 : index
    %c0_0 = arith.constant 0 : index
    %c0_1 = arith.constant 0 : index
    %0 = vector.load %arg3[%c0, %c0_0, %c0_1] : memref<1x4x256xf32, #tpu.memory_space<vmem>>, vector<1x4x256xf32>
    %cst = arith.constant dense<0.000000e+00> : vector<1x256xf32>
    %1 = vector.multi_reduction <add>, %0, %cst [1] : vector<1x4x256xf32> to vector<1x256xf32>
    %cst_2 = arith.constant 2.500000e-01 : f32
    %2 = vector.broadcast %cst_2 : f32 to vector<1x256xf32>
    %3 = arith.mulf %1, %2 : vector<1x256xf32>
    %cst_3 = arith.constant dense<0xFF800000> : vector<1x256xf32>
    %4 = vector.multi_reduction <maximumf>, %0, %cst_3 [1] : vector<1x4x256xf32> to vector<1x256xf32>
    %cst_4 = arith.constant 0.000000e+00 : f32
    %5 = vector.broadcast %cst_4 : f32 to vector<2x1x435xf32>
    %c0_5 = arith.constant 0 : index
    %c0_6 = arith.constant 0 : index
    %c0_7 = arith.constant 0 : index
    %6 = vector.load %arg5[%c0_5, %c0_6, %c0_7] : memref<2x1x435xf32, #tpu.memory_space<vmem>>, vector<2x1x435xf32>
    tpu.vector_store %arg5[%c0_5, %c0_6, %c0_7], %5 {strides = array<i32>} : memref<2x1x435xf32, #tpu.memory_space<vmem>>, vector<2x1x435xf32>,
    %c0_8 = arith.constant 0 : index
    %c0_9 = arith.constant 0 : index
    %c128 = arith.constant 128 : index
    %7 = vector.load %arg5[%c0_8, %c0_9, %c128] : memref<2x1x435xf32, #tpu.memory_space<vmem>>, vector<1x1x256xf32>
    %8 = vector.shape_cast %7 : vector<1x1x256xf32> to vector<1x256xf32>
    %9 = vector.shape_cast %3 : vector<1x256xf32> to vector<1x1x256xf32>
    tpu.vector_store %arg5[%c0_8, %c0_9, %c128], %9 {strides = array<i32>} : memref<2x1x435xf32, #tpu.memory_space<vmem>>, vector<1x1x256xf32>,
    %c1 = arith.constant 1 : index
    %c0_10 = arith.constant 0 : index
    %c128_11 = arith.constant 128 : index
    %10 = vector.load %arg5[%c1, %c0_10, %c128_11] : memref<2x1x435xf32, #tpu.memory_space<vmem>>, vector<1x1x256xf32>
    %11 = vector.shape_cast %10 : vector<1x1x256xf32> to vector<1x256xf32>
    %12 = vector.shape_cast %4 : vector<1x256xf32> to vector<1x1x256xf32>
    tpu.vector_store %arg5[%c1, %c0_10, %c128_11], %12 {strides = array<i32>} : memref<2x1x435xf32, #tpu.memory_space<vmem>>, vector<1x1x256xf32>,
    %cst_12 = arith.constant 0.000000e+00 : f32
    %13 = vector.broadcast %cst_12 : f32 to vector<1x256xf32>
    %cst_13 = arith.constant 0.000000e+00 : f32
    %14 = vector.broadcast %cst_13 : f32 to vector<1x256xf32>
    %c0_14 = arith.constant 0 : index
    %c0_15 = arith.constant 0 : index
    %c77 = arith.constant 77 : index
    %15 = vector.load %arg5[%c0_14, %c0_15, %c77] : memref<2x1x435xf32, #tpu.memory_space<vmem>>, vector<2x1x256xf32>
    %c0_16 = arith.constant 0 : index
    %16 = memref.load %arg1[%c0_16] : memref<98xf32, #tpu.memory_space<smem>>
    %17 = vector.extract_strided_slice %15 {offsets = [0, 0, 0], sizes = [1, 1, 256], strides = [1, 1, 1]} : vector<2x1x256xf32> to vector<1x1x256xf32>
    %18 = vector.shape_cast %17 : vector<1x1x256xf32> to vector<1x256xf32>
    %19 = vector.broadcast %16 : f32 to vector<1x256xf32>
    %20 = arith.mulf %19, %18 : vector<1x256xf32>
    %21 = arith.addf %14, %20 : vector<1x256xf32>
    %c49 = arith.constant 49 : index
    %22 = memref.load %arg1[%c49] : memref<98xf32, #tpu.memory_space<smem>>
    %23 = vector.extract_strided_slice %15 {offsets = [1, 0, 0], sizes = [1, 1, 256], strides = [1, 1, 1]} : vector<2x1x256xf32> to vector<1x1x256xf32>
    %24 = vector.shape_cast %23 : vector<1x1x256xf32> to vector<1x256xf32>
    %25 = vector.broadcast %22 : f32 to vector<1x256xf32>
    %26 = arith.mulf %25, %24 : vector<1x256xf32>
    %27 = arith.addf %21, %26 : vector<1x256xf32>
    %c0_17 = arith.constant 0 : index
    %c0_18 = arith.constant 0 : index
    %c93 = arith.constant 93 : index
    %28 = vector.load %arg5[%c0_17, %c0_18, %c93] : memref<2x1x435xf32, #tpu.memory_space<vmem>>, vector<2x1x256xf32>
    %c7 = arith.constant 7 : index
    %29 = memref.load %arg1[%c7] : memref<98xf32, #tpu.memory_space<smem>>
    %30 = vector.extract_strided_slice %28 {offsets = [0, 0, 0], sizes = [1, 1, 256], strides = [1, 1, 1]} : vector<2x1x256xf32> to vector<1x1x256xf32>
    %31 = vector.shape_cast %30 : vector<1x1x256xf32> to vector<1x256xf32>
    %32 = vector.broadcast %29 : f32 to vector<1x256xf32>
    %33 = arith.mulf %32, %31 : vector<1x256xf32>
    %34 = arith.addf %27, %33 : vector<1x256xf32>
    %c56 = arith.constant 56 : index
    %35 = memref.load %arg1[%c56] : memref<98xf32, #tpu.memory_space<smem>>
    %36 = vector.extract_strided_slice %28 {offsets = [1, 0, 0], sizes = [1, 1, 256], strides = [1, 1, 1]} : vector<2x1x256xf32> to vector<1x1x256xf32>
    %37 = vector.shape_cast %36 : vector<1x1x256xf32> to vector<1x256xf32>
    %38 = vector.broadcast %35 : f32 to vector<1x256xf32>
    %39 = arith.mulf %38, %37 : vector<1x256xf32>
    %40 = arith.addf %34, %39 : vector<1x256xf32>
    %c0_19 = arith.constant 0 : index
    %c0_20 = arith.constant 0 : index
    %c109 = arith.constant 109 : index
    %41 = vector.load %arg5[%c0_19, %c0_20, %c109] : memref<2x1x435xf32, #tpu.memory_space<vmem>>, vector<2x1x256xf32>
    %c14 = arith.constant 14 : index
    %42 = memref.load %arg1[%c14] : memref<98xf32, #tpu.memory_space<smem>>
    %43 = vector.extract_strided_slice %41 {offsets = [0, 0, 0], sizes = [1, 1, 256], strides = [1, 1, 1]} : vector<2x1x256xf32> to vector<1x1x256xf32>
    %44 = vector.shape_cast %43 : vector<1x1x256xf32> to vector<1x256xf32>
    %45 = vector.broadcast %42 : f32 to vector<1x256xf32>
    %46 = arith.mulf %45, %44 : vector<1x256xf32>
    %47 = arith.addf %40, %46 : vector<1x256xf32>
    %c63 = arith.constant 63 : index
    %48 = memref.load %arg1[%c63] : memref<98xf32, #tpu.memory_space<smem>>
    %49 = vector.extract_strided_slice %41 {offsets = [1, 0, 0], sizes = [1, 1, 256], strides = [1, 1, 1]} : vector<2x1x256xf32> to vector<1x1x256xf32>
    %50 = vector.shape_cast %49 : vector<1x1x256xf32> to vector<1x256xf32>
    %51 = vector.broadcast %48 : f32 to vector<1x256xf32>
    %52 = arith.mulf %51, %50 : vector<1x256xf32>
    %53 = arith.addf %47, %52 : vector<1x256xf32>
    %c0_21 = arith.constant 0 : index
    %c0_22 = arith.constant 0 : index
    %c125 = arith.constant 125 : index
    %54 = vector.load %arg5[%c0_21, %c0_22, %c125] : memref<2x1x435xf32, #tpu.memory_space<vmem>>, vector<2x1x256xf32>
    %c21 = arith.constant 21 : index
    %55 = memref.load %arg1[%c21] : memref<98xf32, #tpu.memory_space<smem>>
    %56 = vector.extract_strided_slice %54 {offsets = [0, 0, 0], sizes = [1, 1, 256], strides = [1, 1, 1]} : vector<2x1x256xf32> to vector<1x1x256xf32>
    %57 = vector.shape_cast %56 : vector<1x1x256xf32> to vector<1x256xf32>
    %58 = vector.broadcast %55 : f32 to vector<1x256xf32>
    %59 = arith.mulf %58, %57 : vector<1x256xf32>
    %60 = arith.addf %53, %59 : vector<1x256xf32>
    %c70 = arith.constant 70 : index
    %61 = memref.load %arg1[%c70] : memref<98xf32, #tpu.memory_space<smem>>
    %62 = vector.extract_strided_slice %54 {offsets = [1, 0, 0], sizes = [1, 1, 256], strides = [1, 1, 1]} : vector<2x1x256xf32> to vector<1x1x256xf32>
    %63 = vector.shape_cast %62 : vector<1x1x256xf32> to vector<1x256xf32>
    %64 = vector.broadcast %61 : f32 to vector<1x256xf32>
    %65 = arith.mulf %64, %63 : vector<1x256xf32>
    %66 = arith.addf %60, %65 : vector<1x256xf32>
    %c0_23 = arith.constant 0 : index
    %c0_24 = arith.constant 0 : index
    %c141 = arith.constant 141 : index
    %67 = vector.load %arg5[%c0_23, %c0_24, %c141] : memref<2x1x435xf32, #tpu.memory_space<vmem>>, vector<2x1x256xf32>
    %c28 = arith.constant 28 : index
    %68 = memref.load %arg1[%c28] : memref<98xf32, #tpu.memory_space<smem>>
    %69 = vector.extract_strided_slice %67 {offsets = [0, 0, 0], sizes = [1, 1, 256], strides = [1, 1, 1]} : vector<2x1x256xf32> to vector<1x1x256xf32>
    %70 = vector.shape_cast %69 : vector<1x1x256xf32> to vector<1x256xf32>
    %71 = vector.broadcast %68 : f32 to vector<1x256xf32>
    %72 = arith.mulf %71, %70 : vector<1x256xf32>
    %73 = arith.addf %66, %72 : vector<1x256xf32>
    %c77_25 = arith.constant 77 : index
    %74 = memref.load %arg1[%c77_25] : memref<98xf32, #tpu.memory_space<smem>>
    %75 = vector.extract_strided_slice %67 {offsets = [1, 0, 0], sizes = [1, 1, 256], strides = [1, 1, 1]} : vector<2x1x256xf32> to vector<1x1x256xf32>
    %76 = vector.shape_cast %75 : vector<1x1x256xf32> to vector<1x256xf32>
    %77 = vector.broadcast %74 : f32 to vector<1x256xf32>
    %78 = arith.mulf %77, %76 : vector<1x256xf32>
    %79 = arith.addf %73, %78 : vector<1x256xf32>
    %c0_26 = arith.constant 0 : index
    %c0_27 = arith.constant 0 : index
    %c157 = arith.constant 157 : index
    %80 = vector.load %arg5[%c0_26, %c0_27, %c157] : memref<2x1x435xf32, #tpu.memory_space<vmem>>, vector<2x1x256xf32>
    %c35 = arith.constant 35 : index
    %81 = memref.load %arg1[%c35] : memref<98xf32, #tpu.memory_space<smem>>
    %82 = vector.extract_strided_slice %80 {offsets = [0, 0, 0], sizes = [1, 1, 256], strides = [1, 1, 1]} : vector<2x1x256xf32> to vector<1x1x256xf32>
    %83 = vector.shape_cast %82 : vector<1x1x256xf32> to vector<1x256xf32>
    %84 = vector.broadcast %81 : f32 to vector<1x256xf32>
    %85 = arith.mulf %84, %83 : vector<1x256xf32>
    %86 = arith.addf %79, %85 : vector<1x256xf32>
    %c84 = arith.constant 84 : index
    %87 = memref.load %arg1[%c84] : memref<98xf32, #tpu.memory_space<smem>>
    %88 = vector.extract_strided_slice %80 {offsets = [1, 0, 0], sizes = [1, 1, 256], strides = [1, 1, 1]} : vector<2x1x256xf32> to vector<1x1x256xf32>
    %89 = vector.shape_cast %88 : vector<1x1x256xf32> to vector<1x256xf32>
    %90 = vector.broadcast %87 : f32 to vector<1x256xf32>
    %91 = arith.mulf %90, %89 : vector<1x256xf32>
    %92 = arith.addf %86, %91 : vector<1x256xf32>
    %c0_28 = arith.constant 0 : index
    %c0_29 = arith.constant 0 : index
    %c173 = arith.constant 173 : index
    %93 = vector.load %arg5[%c0_28, %c0_29, %c173] : memref<2x1x435xf32, #tpu.memory_space<vmem>>, vector<2x1x256xf32>
    %c42 = arith.constant 42 : index
    %94 = memref.load %arg1[%c42] : memref<98xf32, #tpu.memory_space<smem>>
    %95 = vector.extract_strided_slice %93 {offsets = [0, 0, 0], sizes = [1, 1, 256], strides = [1, 1, 1]} : vector<2x1x256xf32> to vector<1x1x256xf32>
    %96 = vector.shape_cast %95 : vector<1x1x256xf32> to vector<1x256xf32>
    %97 = vector.broadcast %94 : f32 to vector<1x256xf32>
    %98 = arith.mulf %97, %96 : vector<1x256xf32>
    %99 = arith.addf %92, %98 : vector<1x256xf32>
    %c91 = arith.constant 91 : index
    %100 = memref.load %arg1[%c91] : memref<98xf32, #tpu.memory_space<smem>>
    %101 = vector.extract_strided_slice %93 {offsets = [1, 0, 0], sizes = [1, 1, 256], strides = [1, 1, 1]} : vector<2x1x256xf32> to vector<1x1x256xf32>
    %102 = vector.shape_cast %101 : vector<1x1x256xf32> to vector<1x256xf32>
    %103 = vector.broadcast %100 : f32 to vector<1x256xf32>
    %104 = arith.mulf %103, %102 : vector<1x256xf32>
    %105 = arith.addf %99, %104 : vector<1x256xf32>
    %c0_30 = arith.constant 0 : index
    %c0_31 = arith.constant 0 : index
    %106 = vector.load %arg2[%c0_30, %c0_31] : memref<7x256xf32, #tpu.memory_space<vmem>>, vector<1x256xf32>
    %107 = arith.mulf %106, %105 : vector<1x256xf32>
    %108 = arith.addf %13, %107 : vector<1x256xf32>
    %cst_32 = arith.constant 0.000000e+00 : f32
    %109 = vector.broadcast %cst_32 : f32 to vector<1x256xf32>
    %c0_33 = arith.constant 0 : index
    %c0_34 = arith.constant 0 : index
    %c78 = arith.constant 78 : index
    %110 = vector.load %arg5[%c0_33, %c0_34, %c78] : memref<2x1x435xf32, #tpu.memory_space<vmem>>, vector<2x1x256xf32>
    %c1_35 = arith.constant 1 : index
    %111 = memref.load %arg1[%c1_35] : memref<98xf32, #tpu.memory_space<smem>>
    %112 = vector.extract_strided_slice %110 {offsets = [0, 0, 0], sizes = [1, 1, 256], strides = [1, 1, 1]} : vector<2x1x256xf32> to vector<1x1x256xf32>
    %113 = vector.shape_cast %112 : vector<1x1x256xf32> to vector<1x256xf32>
    %114 = vector.broadcast %111 : f32 to vector<1x256xf32>
    %115 = arith.mulf %114, %113 : vector<1x256xf32>
    %116 = arith.addf %109, %115 : vector<1x256xf32>
    %c50 = arith.constant 50 : index
    %117 = memref.load %arg1[%c50] : memref<98xf32, #tpu.memory_space<smem>>
    %118 = vector.extract_strided_slice %110 {offsets = [1, 0, 0], sizes = [1, 1, 256], strides = [1, 1, 1]} : vector<2x1x256xf32> to vector<1x1x256xf32>
    %119 = vector.shape_cast %118 : vector<1x1x256xf32> to vector<1x256xf32>
    %120 = vector.broadcast %117 : f32 to vector<1x256xf32>
    %121 = arith.mulf %120, %119 : vector<1x256xf32>
    %122 = arith.addf %116, %121 : vector<1x256xf32>
    %c0_36 = arith.constant 0 : index
    %c0_37 = arith.constant 0 : index
    %c94 = arith.constant 94 : index
    %123 = vector.load %arg5[%c0_36, %c0_37, %c94] : memref<2x1x435xf32, #tpu.memory_space<vmem>>, vector<2x1x256xf32>
    %c8 = arith.constant 8 : index
    %124 = memref.load %arg1[%c8] : memref<98xf32, #tpu.memory_space<smem>>
    %125 = vector.extract_strided_slice %123 {offsets = [0, 0, 0], sizes = [1, 1, 256], strides = [1, 1, 1]} : vector<2x1x256xf32> to vector<1x1x256xf32>
    %126 = vector.shape_cast %125 : vector<1x1x256xf32> to vector<1x256xf32>
    %127 = vector.broadcast %124 : f32 to vector<1x256xf32>
    %128 = arith.mulf %127, %126 : vector<1x256xf32>
    %129 = arith.addf %122, %128 : vector<1x256xf32>
    %c57 = arith.constant 57 : index
    %130 = memref.load %arg1[%c57] : memref<98xf32, #tpu.memory_space<smem>>
    %131 = vector.extract_strided_slice %123 {offsets = [1, 0, 0], sizes = [1, 1, 256], strides = [1, 1, 1]} : vector<2x1x256xf32> to vector<1x1x256xf32>
    %132 = vector.shape_cast %131 : vector<1x1x256xf32> to vector<1x256xf32>
    %133 = vector.broadcast %130 : f32 to vector<1x256xf32>
    %134 = arith.mulf %133, %132 : vector<1x256xf32>
    %135 = arith.addf %129, %134 : vector<1x256xf32>
    %c0_38 = arith.constant 0 : index
    %c0_39 = arith.constant 0 : index
    %c110 = arith.constant 110 : index
    %136 = vector.load %arg5[%c0_38, %c0_39, %c110] : memref<2x1x435xf32, #tpu.memory_space<vmem>>, vector<2x1x256xf32>
    %c15 = arith.constant 15 : index
    %137 = memref.load %arg1[%c15] : memref<98xf32, #tpu.memory_space<smem>>
    %138 = vector.extract_strided_slice %136 {offsets = [0, 0, 0], sizes = [1, 1, 256], strides = [1, 1, 1]} : vector<2x1x256xf32> to vector<1x1x256xf32>
    %139 = vector.shape_cast %138 : vector<1x1x256xf32> to vector<1x256xf32>
    %140 = vector.broadcast %137 : f32 to vector<1x256xf32>
    %141 = arith.mulf %140, %139 : vector<1x256xf32>
    %142 = arith.addf %135, %141 : vector<1x256xf32>
    %c64 = arith.constant 64 : index
    %143 = memref.load %arg1[%c64] : memref<98xf32, #tpu.memory_space<smem>>
    %144 = vector.extract_strided_slice %136 {offsets = [1, 0, 0], sizes = [1, 1, 256], strides = [1, 1, 1]} : vector<2x1x256xf32> to vector<1x1x256xf32>
    %145 = vector.shape_cast %144 : vector<1x1x256xf32> to vector<1x256xf32>
    %146 = vector.broadcast %143 : f32 to vector<1x256xf32>
    %147 = arith.mulf %146, %145 : vector<1x256xf32>
    %148 = arith.addf %142, %147 : vector<1x256xf32>
    %c0_40 = arith.constant 0 : index
    %c0_41 = arith.constant 0 : index
    %c126 = arith.constant 126 : index
    %149 = vector.load %arg5[%c0_40, %c0_41, %c126] : memref<2x1x435xf32, #tpu.memory_space<vmem>>, vector<2x1x256xf32>
    %c22 = arith.constant 22 : index
    %150 = memref.load %arg1[%c22] : memref<98xf32, #tpu.memory_space<smem>>
    %151 = vector.extract_strided_slice %149 {offsets = [0, 0, 0], sizes = [1, 1, 256], strides = [1, 1, 1]} : vector<2x1x256xf32> to vector<1x1x256xf32>
    %152 = vector.shape_cast %151 : vector<1x1x256xf32> to vector<1x256xf32>
    %153 = vector.broadcast %150 : f32 to vector<1x256xf32>
    %154 = arith.mulf %153, %152 : vector<1x256xf32>
    %155 = arith.addf %148, %154 : vector<1x256xf32>
    %c71 = arith.constant 71 : index
    %156 = memref.load %arg1[%c71] : memref<98xf32, #tpu.memory_space<smem>>
    %157 = vector.extract_strided_slice %149 {offsets = [1, 0, 0], sizes = [1, 1, 256], strides = [1, 1, 1]} : vector<2x1x256xf32> to vector<1x1x256xf32>
    %158 = vector.shape_cast %157 : vector<1x1x256xf32> to vector<1x256xf32>
    %159 = vector.broadcast %156 : f32 to vector<1x256xf32>
    %160 = arith.mulf %159, %158 : vector<1x256xf32>
    %161 = arith.addf %155, %160 : vector<1x256xf32>
    %c0_42 = arith.constant 0 : index
    %c0_43 = arith.constant 0 : index
    %c142 = arith.constant 142 : index
    %162 = vector.load %arg5[%c0_42, %c0_43, %c142] : memref<2x1x435xf32, #tpu.memory_space<vmem>>, vector<2x1x256xf32>
    %c29 = arith.constant 29 : index
    %163 = memref.load %arg1[%c29] : memref<98xf32, #tpu.memory_space<smem>>
    %164 = vector.extract_strided_slice %162 {offsets = [0, 0, 0], sizes = [1, 1, 256], strides = [1, 1, 1]} : vector<2x1x256xf32> to vector<1x1x256xf32>
    %165 = vector.shape_cast %164 : vector<1x1x256xf32> to vector<1x256xf32>
    %166 = vector.broadcast %163 : f32 to vector<1x256xf32>
    %167 = arith.mulf %166, %165 : vector<1x256xf32>
    %168 = arith.addf %161, %167 : vector<1x256xf32>
    %c78_44 = arith.constant 78 : index
    %169 = memref.load %arg1[%c78_44] : memref<98xf32, #tpu.memory_space<smem>>
    %170 = vector.extract_strided_slice %162 {offsets = [1, 0, 0], sizes = [1, 1, 256], strides = [1, 1, 1]} : vector<2x1x256xf32> to vector<1x1x256xf32>
    %171 = vector.shape_cast %170 : vector<1x1x256xf32> to vector<1x256xf32>
    %172 = vector.broadcast %169 : f32 to vector<1x256xf32>
    %173 = arith.mulf %172, %171 : vector<1x256xf32>
    %174 = arith.addf %168, %173 : vector<1x256xf32>
    %c0_45 = arith.constant 0 : index
    %c0_46 = arith.constant 0 : index
    %c158 = arith.constant 158 : index
    %175 = vector.load %arg5[%c0_45, %c0_46, %c158] : memref<2x1x435xf32, #tpu.memory_space<vmem>>, vector<2x1x256xf32>
    %c36 = arith.constant 36 : index
    %176 = memref.load %arg1[%c36] : memref<98xf32, #tpu.memory_space<smem>>
    %177 = vector.extract_strided_slice %175 {offsets = [0, 0, 0], sizes = [1, 1, 256], strides = [1, 1, 1]} : vector<2x1x256xf32> to vector<1x1x256xf32>
    %178 = vector.shape_cast %177 : vector<1x1x256xf32> to vector<1x256xf32>
    %179 = vector.broadcast %176 : f32 to vector<1x256xf32>
    %180 = arith.mulf %179, %178 : vector<1x256xf32>
    %181 = arith.addf %174, %180 : vector<1x256xf32>
    %c85 = arith.constant 85 : index
    %182 = memref.load %arg1[%c85] : memref<98xf32, #tpu.memory_space<smem>>
    %183 = vector.extract_strided_slice %175 {offsets = [1, 0, 0], sizes = [1, 1, 256], strides = [1, 1, 1]} : vector<2x1x256xf32> to vector<1x1x256xf32>
    %184 = vector.shape_cast %183 : vector<1x1x256xf32> to vector<1x256xf32>
    %185 = vector.broadcast %182 : f32 to vector<1x256xf32>
    %186 = arith.mulf %185, %184 : vector<1x256xf32>
    %187 = arith.addf %181, %186 : vector<1x256xf32>
    %c0_47 = arith.constant 0 : index
    %c0_48 = arith.constant 0 : index
    %c174 = arith.constant 174 : index
    %188 = vector.load %arg5[%c0_47, %c0_48, %c174] : memref<2x1x435xf32, #tpu.memory_space<vmem>>, vector<2x1x256xf32>
    %c43 = arith.constant 43 : index
    %189 = memref.load %arg1[%c43] : memref<98xf32, #tpu.memory_space<smem>>
    %190 = vector.extract_strided_slice %188 {offsets = [0, 0, 0], sizes = [1, 1, 256], strides = [1, 1, 1]} : vector<2x1x256xf32> to vector<1x1x256xf32>
    %191 = vector.shape_cast %190 : vector<1x1x256xf32> to vector<1x256xf32>
    %192 = vector.broadcast %189 : f32 to vector<1x256xf32>
    %193 = arith.mulf %192, %191 : vector<1x256xf32>
    %194 = arith.addf %187, %193 : vector<1x256xf32>
    %c92 = arith.constant 92 : index
    %195 = memref.load %arg1[%c92] : memref<98xf32, #tpu.memory_space<smem>>
    %196 = vector.extract_strided_slice %188 {offsets = [1, 0, 0], sizes = [1, 1, 256], strides = [1, 1, 1]} : vector<2x1x256xf32> to vector<1x1x256xf32>
    %197 = vector.shape_cast %196 : vector<1x1x256xf32> to vector<1x256xf32>
    %198 = vector.broadcast %195 : f32 to vector<1x256xf32>
    %199 = arith.mulf %198, %197 : vector<1x256xf32>
    %200 = arith.addf %194, %199 : vector<1x256xf32>
    %c1_49 = arith.constant 1 : index
    %c0_50 = arith.constant 0 : index
    %201 = vector.load %arg2[%c1_49, %c0_50] : memref<7x256xf32, #tpu.memory_space<vmem>>, vector<1x256xf32>
    %202 = arith.mulf %201, %200 : vector<1x256xf32>
    %203 = arith.addf %108, %202 : vector<1x256xf32>
    %cst_51 = arith.constant 0.000000e+00 : f32
    %204 = vector.broadcast %cst_51 : f32 to vector<1x256xf32>
    %c0_52 = arith.constant 0 : index
    %c0_53 = arith.constant 0 : index
    %c79 = arith.constant 79 : index
    %205 = vector.load %arg5[%c0_52, %c0_53, %c79] : memref<2x1x435xf32, #tpu.memory_space<vmem>>, vector<2x1x256xf32>
    %c2 = arith.constant 2 : index
    %206 = memref.load %arg1[%c2] : memref<98xf32, #tpu.memory_space<smem>>
    %207 = vector.extract_strided_slice %205 {offsets = [0, 0, 0], sizes = [1, 1, 256], strides = [1, 1, 1]} : vector<2x1x256xf32> to vector<1x1x256xf32>
    %208 = vector.shape_cast %207 : vector<1x1x256xf32> to vector<1x256xf32>
    %209 = vector.broadcast %206 : f32 to vector<1x256xf32>
    %210 = arith.mulf %209, %208 : vector<1x256xf32>
    %211 = arith.addf %204, %210 : vector<1x256xf32>
    %c51 = arith.constant 51 : index
    %212 = memref.load %arg1[%c51] : memref<98xf32, #tpu.memory_space<smem>>
    %213 = vector.extract_strided_slice %205 {offsets = [1, 0, 0], sizes = [1, 1, 256], strides = [1, 1, 1]} : vector<2x1x256xf32> to vector<1x1x256xf32>
    %214 = vector.shape_cast %213 : vector<1x1x256xf32> to vector<1x256xf32>
    %215 = vector.broadcast %212 : f32 to vector<1x256xf32>
    %216 = arith.mulf %215, %214 : vector<1x256xf32>
    %217 = arith.addf %211, %216 : vector<1x256xf32>
    %c0_54 = arith.constant 0 : index
    %c0_55 = arith.constant 0 : index
    %c95 = arith.constant 95 : index
    %218 = vector.load %arg5[%c0_54, %c0_55, %c95] : memref<2x1x435xf32, #tpu.memory_space<vmem>>, vector<2x1x256xf32>
    %c9 = arith.constant 9 : index
    %219 = memref.load %arg1[%c9] : memref<98xf32, #tpu.memory_space<smem>>
    %220 = vector.extract_strided_slice %218 {offsets = [0, 0, 0], sizes = [1, 1, 256], strides = [1, 1, 1]} : vector<2x1x256xf32> to vector<1x1x256xf32>
    %221 = vector.shape_cast %220 : vector<1x1x256xf32> to vector<1x256xf32>
    %222 = vector.broadcast %219 : f32 to vector<1x256xf32>
    %223 = arith.mulf %222, %221 : vector<1x256xf32>
    %224 = arith.addf %217, %223 : vector<1x256xf32>
    %c58 = arith.constant 58 : index
    %225 = memref.load %arg1[%c58] : memref<98xf32, #tpu.memory_space<smem>>
    %226 = vector.extract_strided_slice %218 {offsets = [1, 0, 0], sizes = [1, 1, 256], strides = [1, 1, 1]} : vector<2x1x256xf32> to vector<1x1x256xf32>
    %227 = vector.shape_cast %226 : vector<1x1x256xf32> to vector<1x256xf32>
    %228 = vector.broadcast %225 : f32 to vector<1x256xf32>
    %229 = arith.mulf %228, %227 : vector<1x256xf32>
    %230 = arith.addf %224, %229 : vector<1x256xf32>
    %c0_56 = arith.constant 0 : index
    %c0_57 = arith.constant 0 : index
    %c111 = arith.constant 111 : index
    %231 = vector.load %arg5[%c0_56, %c0_57, %c111] : memref<2x1x435xf32, #tpu.memory_space<vmem>>, vector<2x1x256xf32>
    %c16 = arith.constant 16 : index
    %232 = memref.load %arg1[%c16] : memref<98xf32, #tpu.memory_space<smem>>
    %233 = vector.extract_strided_slice %231 {offsets = [0, 0, 0], sizes = [1, 1, 256], strides = [1, 1, 1]} : vector<2x1x256xf32> to vector<1x1x256xf32>
    %234 = vector.shape_cast %233 : vector<1x1x256xf32> to vector<1x256xf32>
    %235 = vector.broadcast %232 : f32 to vector<1x256xf32>
    %236 = arith.mulf %235, %234 : vector<1x256xf32>
    %237 = arith.addf %230, %236 : vector<1x256xf32>
    %c65 = arith.constant 65 : index
    %238 = memref.load %arg1[%c65] : memref<98xf32, #tpu.memory_space<smem>>
    %239 = vector.extract_strided_slice %231 {offsets = [1, 0, 0], sizes = [1, 1, 256], strides = [1, 1, 1]} : vector<2x1x256xf32> to vector<1x1x256xf32>
    %240 = vector.shape_cast %239 : vector<1x1x256xf32> to vector<1x256xf32>
    %241 = vector.broadcast %238 : f32 to vector<1x256xf32>
    %242 = arith.mulf %241, %240 : vector<1x256xf32>
    %243 = arith.addf %237, %242 : vector<1x256xf32>
    %c0_58 = arith.constant 0 : index
    %c0_59 = arith.constant 0 : index
    %c127 = arith.constant 127 : index
    %244 = vector.load %arg5[%c0_58, %c0_59, %c127] : memref<2x1x435xf32, #tpu.memory_space<vmem>>, vector<2x1x256xf32>
    %c23 = arith.constant 23 : index
    %245 = memref.load %arg1[%c23] : memref<98xf32, #tpu.memory_space<smem>>
    %246 = vector.extract_strided_slice %244 {offsets = [0, 0, 0], sizes = [1, 1, 256], strides = [1, 1, 1]} : vector<2x1x256xf32> to vector<1x1x256xf32>
    %247 = vector.shape_cast %246 : vector<1x1x256xf32> to vector<1x256xf32>
    %248 = vector.broadcast %245 : f32 to vector<1x256xf32>
    %249 = arith.mulf %248, %247 : vector<1x256xf32>
    %250 = arith.addf %243, %249 : vector<1x256xf32>
    %c72 = arith.constant 72 : index
    %251 = memref.load %arg1[%c72] : memref<98xf32, #tpu.memory_space<smem>>
    %252 = vector.extract_strided_slice %244 {offsets = [1, 0, 0], sizes = [1, 1, 256], strides = [1, 1, 1]} : vector<2x1x256xf32> to vector<1x1x256xf32>
    %253 = vector.shape_cast %252 : vector<1x1x256xf32> to vector<1x256xf32>
    %254 = vector.broadcast %251 : f32 to vector<1x256xf32>
    %255 = arith.mulf %254, %253 : vector<1x256xf32>
    %256 = arith.addf %250, %255 : vector<1x256xf32>
    %c0_60 = arith.constant 0 : index
    %c0_61 = arith.constant 0 : index
    %c143 = arith.constant 143 : index
    %257 = vector.load %arg5[%c0_60, %c0_61, %c143] : memref<2x1x435xf32, #tpu.memory_space<vmem>>, vector<2x1x256xf32>
    %c30 = arith.constant 30 : index
    %258 = memref.load %arg1[%c30] : memref<98xf32, #tpu.memory_space<smem>>
    %259 = vector.extract_strided_slice %257 {offsets = [0, 0, 0], sizes = [1, 1, 256], strides = [1, 1, 1]} : vector<2x1x256xf32> to vector<1x1x256xf32>
    %260 = vector.shape_cast %259 : vector<1x1x256xf32> to vector<1x256xf32>
    %261 = vector.broadcast %258 : f32 to vector<1x256xf32>
    %262 = arith.mulf %261, %260 : vector<1x256xf32>
    %263 = arith.addf %256, %262 : vector<1x256xf32>
    %c79_62 = arith.constant 79 : index
    %264 = memref.load %arg1[%c79_62] : memref<98xf32, #tpu.memory_space<smem>>
    %265 = vector.extract_strided_slice %257 {offsets = [1, 0, 0], sizes = [1, 1, 256], strides = [1, 1, 1]} : vector<2x1x256xf32> to vector<1x1x256xf32>
    %266 = vector.shape_cast %265 : vector<1x1x256xf32> to vector<1x256xf32>
    %267 = vector.broadcast %264 : f32 to vector<1x256xf32>
    %268 = arith.mulf %267, %266 : vector<1x256xf32>
    %269 = arith.addf %263, %268 : vector<1x256xf32>
    %c0_63 = arith.constant 0 : index
    %c0_64 = arith.constant 0 : index
    %c159 = arith.constant 159 : index
    %270 = vector.load %arg5[%c0_63, %c0_64, %c159] : memref<2x1x435xf32, #tpu.memory_space<vmem>>, vector<2x1x256xf32>
    %c37 = arith.constant 37 : index
    %271 = memref.load %arg1[%c37] : memref<98xf32, #tpu.memory_space<smem>>
    %272 = vector.extract_strided_slice %270 {offsets = [0, 0, 0], sizes = [1, 1, 256], strides = [1, 1, 1]} : vector<2x1x256xf32> to vector<1x1x256xf32>
    %273 = vector.shape_cast %272 : vector<1x1x256xf32> to vector<1x256xf32>
    %274 = vector.broadcast %271 : f32 to vector<1x256xf32>
    %275 = arith.mulf %274, %273 : vector<1x256xf32>
    %276 = arith.addf %269, %275 : vector<1x256xf32>
    %c86 = arith.constant 86 : index
    %277 = memref.load %arg1[%c86] : memref<98xf32, #tpu.memory_space<smem>>
    %278 = vector.extract_strided_slice %270 {offsets = [1, 0, 0], sizes = [1, 1, 256], strides = [1, 1, 1]} : vector<2x1x256xf32> to vector<1x1x256xf32>
    %279 = vector.shape_cast %278 : vector<1x1x256xf32> to vector<1x256xf32>
    %280 = vector.broadcast %277 : f32 to vector<1x256xf32>
    %281 = arith.mulf %280, %279 : vector<1x256xf32>
    %282 = arith.addf %276, %281 : vector<1x256xf32>
    %c0_65 = arith.constant 0 : index
    %c0_66 = arith.constant 0 : index
    %c175 = arith.constant 175 : index
    %283 = vector.load %arg5[%c0_65, %c0_66, %c175] : memref<2x1x435xf32, #tpu.memory_space<vmem>>, vector<2x1x256xf32>
    %c44 = arith.constant 44 : index
    %284 = memref.load %arg1[%c44] : memref<98xf32, #tpu.memory_space<smem>>
    %285 = vector.extract_strided_slice %283 {offsets = [0, 0, 0], sizes = [1, 1, 256], strides = [1, 1, 1]} : vector<2x1x256xf32> to vector<1x1x256xf32>
    %286 = vector.shape_cast %285 : vector<1x1x256xf32> to vector<1x256xf32>
    %287 = vector.broadcast %284 : f32 to vector<1x256xf32>
    %288 = arith.mulf %287, %286 : vector<1x256xf32>
    %289 = arith.addf %282, %288 : vector<1x256xf32>
    %c93_67 = arith.constant 93 : index
    %290 = memref.load %arg1[%c93_67] : memref<98xf32, #tpu.memory_space<smem>>
    %291 = vector.extract_strided_slice %283 {offsets = [1, 0, 0], sizes = [1, 1, 256], strides = [1, 1, 1]} : vector<2x1x256xf32> to vector<1x1x256xf32>
    %292 = vector.shape_cast %291 : vector<1x1x256xf32> to vector<1x256xf32>
    %293 = vector.broadcast %290 : f32 to vector<1x256xf32>
    %294 = arith.mulf %293, %292 : vector<1x256xf32>
    %295 = arith.addf %289, %294 : vector<1x256xf32>
    %c2_68 = arith.constant 2 : index
    %c0_69 = arith.constant 0 : index
    %296 = vector.load %arg2[%c2_68, %c0_69] : memref<7x256xf32, #tpu.memory_space<vmem>>, vector<1x256xf32>
    %297 = arith.mulf %296, %295 : vector<1x256xf32>
    %298 = arith.addf %203, %297 : vector<1x256xf32>
    %cst_70 = arith.constant 0.000000e+00 : f32
    %299 = vector.broadcast %cst_70 : f32 to vector<1x256xf32>
    %c0_71 = arith.constant 0 : index
    %c0_72 = arith.constant 0 : index
    %c80 = arith.constant 80 : index
    %300 = vector.load %arg5[%c0_71, %c0_72, %c80] : memref<2x1x435xf32, #tpu.memory_space<vmem>>, vector<2x1x256xf32>
    %c3 = arith.constant 3 : index
    %301 = memref.load %arg1[%c3] : memref<98xf32, #tpu.memory_space<smem>>
    %302 = vector.extract_strided_slice %300 {offsets = [0, 0, 0], sizes = [1, 1, 256], strides = [1, 1, 1]} : vector<2x1x256xf32> to vector<1x1x256xf32>
    %303 = vector.shape_cast %302 : vector<1x1x256xf32> to vector<1x256xf32>
    %304 = vector.broadcast %301 : f32 to vector<1x256xf32>
    %305 = arith.mulf %304, %303 : vector<1x256xf32>
    %306 = arith.addf %299, %305 : vector<1x256xf32>
    %c52 = arith.constant 52 : index
    %307 = memref.load %arg1[%c52] : memref<98xf32, #tpu.memory_space<smem>>
    %308 = vector.extract_strided_slice %300 {offsets = [1, 0, 0], sizes = [1, 1, 256], strides = [1, 1, 1]} : vector<2x1x256xf32> to vector<1x1x256xf32>
    %309 = vector.shape_cast %308 : vector<1x1x256xf32> to vector<1x256xf32>
    %310 = vector.broadcast %307 : f32 to vector<1x256xf32>
    %311 = arith.mulf %310, %309 : vector<1x256xf32>
    %312 = arith.addf %306, %311 : vector<1x256xf32>
    %c0_73 = arith.constant 0 : index
    %c0_74 = arith.constant 0 : index
    %c96 = arith.constant 96 : index
    %313 = vector.load %arg5[%c0_73, %c0_74, %c96] : memref<2x1x435xf32, #tpu.memory_space<vmem>>, vector<2x1x256xf32>
    %c10 = arith.constant 10 : index
    %314 = memref.load %arg1[%c10] : memref<98xf32, #tpu.memory_space<smem>>
    %315 = vector.extract_strided_slice %313 {offsets = [0, 0, 0], sizes = [1, 1, 256], strides = [1, 1, 1]} : vector<2x1x256xf32> to vector<1x1x256xf32>
    %316 = vector.shape_cast %315 : vector<1x1x256xf32> to vector<1x256xf32>
    %317 = vector.broadcast %314 : f32 to vector<1x256xf32>
    %318 = arith.mulf %317, %316 : vector<1x256xf32>
    %319 = arith.addf %312, %318 : vector<1x256xf32>
    %c59 = arith.constant 59 : index
    %320 = memref.load %arg1[%c59] : memref<98xf32, #tpu.memory_space<smem>>
    %321 = vector.extract_strided_slice %313 {offsets = [1, 0, 0], sizes = [1, 1, 256], strides = [1, 1, 1]} : vector<2x1x256xf32> to vector<1x1x256xf32>
    %322 = vector.shape_cast %321 : vector<1x1x256xf32> to vector<1x256xf32>
    %323 = vector.broadcast %320 : f32 to vector<1x256xf32>
    %324 = arith.mulf %323, %322 : vector<1x256xf32>
    %325 = arith.addf %319, %324 : vector<1x256xf32>
    %c0_75 = arith.constant 0 : index
    %c0_76 = arith.constant 0 : index
    %c112 = arith.constant 112 : index
    %326 = vector.load %arg5[%c0_75, %c0_76, %c112] : memref<2x1x435xf32, #tpu.memory_space<vmem>>, vector<2x1x256xf32>
    %c17 = arith.constant 17 : index
    %327 = memref.load %arg1[%c17] : memref<98xf32, #tpu.memory_space<smem>>
    %328 = vector.extract_strided_slice %326 {offsets = [0, 0, 0], sizes = [1, 1, 256], strides = [1, 1, 1]} : vector<2x1x256xf32> to vector<1x1x256xf32>
    %329 = vector.shape_cast %328 : vector<1x1x256xf32> to vector<1x256xf32>
    %330 = vector.broadcast %327 : f32 to vector<1x256xf32>
    %331 = arith.mulf %330, %329 : vector<1x256xf32>
    %332 = arith.addf %325, %331 : vector<1x256xf32>
    %c66 = arith.constant 66 : index
    %333 = memref.load %arg1[%c66] : memref<98xf32, #tpu.memory_space<smem>>
    %334 = vector.extract_strided_slice %326 {offsets = [1, 0, 0], sizes = [1, 1, 256], strides = [1, 1, 1]} : vector<2x1x256xf32> to vector<1x1x256xf32>
    %335 = vector.shape_cast %334 : vector<1x1x256xf32> to vector<1x256xf32>
    %336 = vector.broadcast %333 : f32 to vector<1x256xf32>
    %337 = arith.mulf %336, %335 : vector<1x256xf32>
    %338 = arith.addf %332, %337 : vector<1x256xf32>
    %c0_77 = arith.constant 0 : index
    %c0_78 = arith.constant 0 : index
    %c128_79 = arith.constant 128 : index
    %339 = vector.load %arg5[%c0_77, %c0_78, %c128_79] : memref<2x1x435xf32, #tpu.memory_space<vmem>>, vector<2x1x256xf32>
    %c24 = arith.constant 24 : index
    %340 = memref.load %arg1[%c24] : memref<98xf32, #tpu.memory_space<smem>>
    %341 = vector.extract_strided_slice %339 {offsets = [0, 0, 0], sizes = [1, 1, 256], strides = [1, 1, 1]} : vector<2x1x256xf32> to vector<1x1x256xf32>
    %342 = vector.shape_cast %341 : vector<1x1x256xf32> to vector<1x256xf32>
    %343 = vector.broadcast %340 : f32 to vector<1x256xf32>
    %344 = arith.mulf %343, %342 : vector<1x256xf32>
    %345 = arith.addf %338, %344 : vector<1x256xf32>
    %c73 = arith.constant 73 : index
    %346 = memref.load %arg1[%c73] : memref<98xf32, #tpu.memory_space<smem>>
    %347 = vector.extract_strided_slice %339 {offsets = [1, 0, 0], sizes = [1, 1, 256], strides = [1, 1, 1]} : vector<2x1x256xf32> to vector<1x1x256xf32>
    %348 = vector.shape_cast %347 : vector<1x1x256xf32> to vector<1x256xf32>
    %349 = vector.broadcast %346 : f32 to vector<1x256xf32>
    %350 = arith.mulf %349, %348 : vector<1x256xf32>
    %351 = arith.addf %345, %350 : vector<1x256xf32>
    %c0_80 = arith.constant 0 : index
    %c0_81 = arith.constant 0 : index
    %c144 = arith.constant 144 : index
    %352 = vector.load %arg5[%c0_80, %c0_81, %c144] : memref<2x1x435xf32, #tpu.memory_space<vmem>>, vector<2x1x256xf32>
    %c31 = arith.constant 31 : index
    %353 = memref.load %arg1[%c31] : memref<98xf32, #tpu.memory_space<smem>>
    %354 = vector.extract_strided_slice %352 {offsets = [0, 0, 0], sizes = [1, 1, 256], strides = [1, 1, 1]} : vector<2x1x256xf32> to vector<1x1x256xf32>
    %355 = vector.shape_cast %354 : vector<1x1x256xf32> to vector<1x256xf32>
    %356 = vector.broadcast %353 : f32 to vector<1x256xf32>
    %357 = arith.mulf %356, %355 : vector<1x256xf32>
    %358 = arith.addf %351, %357 : vector<1x256xf32>
    %c80_82 = arith.constant 80 : index
    %359 = memref.load %arg1[%c80_82] : memref<98xf32, #tpu.memory_space<smem>>
    %360 = vector.extract_strided_slice %352 {offsets = [1, 0, 0], sizes = [1, 1, 256], strides = [1, 1, 1]} : vector<2x1x256xf32> to vector<1x1x256xf32>
    %361 = vector.shape_cast %360 : vector<1x1x256xf32> to vector<1x256xf32>
    %362 = vector.broadcast %359 : f32 to vector<1x256xf32>
    %363 = arith.mulf %362, %361 : vector<1x256xf32>
    %364 = arith.addf %358, %363 : vector<1x256xf32>
    %c0_83 = arith.constant 0 : index
    %c0_84 = arith.constant 0 : index
    %c160 = arith.constant 160 : index
    %365 = vector.load %arg5[%c0_83, %c0_84, %c160] : memref<2x1x435xf32, #tpu.memory_space<vmem>>, vector<2x1x256xf32>
    %c38 = arith.constant 38 : index
    %366 = memref.load %arg1[%c38] : memref<98xf32, #tpu.memory_space<smem>>
    %367 = vector.extract_strided_slice %365 {offsets = [0, 0, 0], sizes = [1, 1, 256], strides = [1, 1, 1]} : vector<2x1x256xf32> to vector<1x1x256xf32>
    %368 = vector.shape_cast %367 : vector<1x1x256xf32> to vector<1x256xf32>
    %369 = vector.broadcast %366 : f32 to vector<1x256xf32>
    %370 = arith.mulf %369, %368 : vector<1x256xf32>
    %371 = arith.addf %364, %370 : vector<1x256xf32>
    %c87 = arith.constant 87 : index
    %372 = memref.load %arg1[%c87] : memref<98xf32, #tpu.memory_space<smem>>
    %373 = vector.extract_strided_slice %365 {offsets = [1, 0, 0], sizes = [1, 1, 256], strides = [1, 1, 1]} : vector<2x1x256xf32> to vector<1x1x256xf32>
    %374 = vector.shape_cast %373 : vector<1x1x256xf32> to vector<1x256xf32>
    %375 = vector.broadcast %372 : f32 to vector<1x256xf32>
    %376 = arith.mulf %375, %374 : vector<1x256xf32>
    %377 = arith.addf %371, %376 : vector<1x256xf32>
    %c0_85 = arith.constant 0 : index
    %c0_86 = arith.constant 0 : index
    %c176 = arith.constant 176 : index
    %378 = vector.load %arg5[%c0_85, %c0_86, %c176] : memref<2x1x435xf32, #tpu.memory_space<vmem>>, vector<2x1x256xf32>
    %c45 = arith.constant 45 : index
    %379 = memref.load %arg1[%c45] : memref<98xf32, #tpu.memory_space<smem>>
    %380 = vector.extract_strided_slice %378 {offsets = [0, 0, 0], sizes = [1, 1, 256], strides = [1, 1, 1]} : vector<2x1x256xf32> to vector<1x1x256xf32>
    %381 = vector.shape_cast %380 : vector<1x1x256xf32> to vector<1x256xf32>
    %382 = vector.broadcast %379 : f32 to vector<1x256xf32>
    %383 = arith.mulf %382, %381 : vector<1x256xf32>
    %384 = arith.addf %377, %383 : vector<1x256xf32>
    %c94_87 = arith.constant 94 : index
    %385 = memref.load %arg1[%c94_87] : memref<98xf32, #tpu.memory_space<smem>>
    %386 = vector.extract_strided_slice %378 {offsets = [1, 0, 0], sizes = [1, 1, 256], strides = [1, 1, 1]} : vector<2x1x256xf32> to vector<1x1x256xf32>
    %387 = vector.shape_cast %386 : vector<1x1x256xf32> to vector<1x256xf32>
    %388 = vector.broadcast %385 : f32 to vector<1x256xf32>
    %389 = arith.mulf %388, %387 : vector<1x256xf32>
    %390 = arith.addf %384, %389 : vector<1x256xf32>
    %c3_88 = arith.constant 3 : index
    %c0_89 = arith.constant 0 : index
    %391 = vector.load %arg2[%c3_88, %c0_89] : memref<7x256xf32, #tpu.memory_space<vmem>>, vector<1x256xf32>
    %392 = arith.mulf %391, %390 : vector<1x256xf32>
    %393 = arith.addf %298, %392 : vector<1x256xf32>
    %cst_90 = arith.constant 0.000000e+00 : f32
    %394 = vector.broadcast %cst_90 : f32 to vector<1x256xf32>
    %c0_91 = arith.constant 0 : index
    %c0_92 = arith.constant 0 : index
    %c81 = arith.constant 81 : index
    %395 = vector.load %arg5[%c0_91, %c0_92, %c81] : memref<2x1x435xf32, #tpu.memory_space<vmem>>, vector<2x1x256xf32>
    %c4 = arith.constant 4 : index
    %396 = memref.load %arg1[%c4] : memref<98xf32, #tpu.memory_space<smem>>
    %397 = vector.extract_strided_slice %395 {offsets = [0, 0, 0], sizes = [1, 1, 256], strides = [1, 1, 1]} : vector<2x1x256xf32> to vector<1x1x256xf32>
    %398 = vector.shape_cast %397 : vector<1x1x256xf32> to vector<1x256xf32>
    %399 = vector.broadcast %396 : f32 to vector<1x256xf32>
    %400 = arith.mulf %399, %398 : vector<1x256xf32>
    %401 = arith.addf %394, %400 : vector<1x256xf32>
    %c53 = arith.constant 53 : index
    %402 = memref.load %arg1[%c53] : memref<98xf32, #tpu.memory_space<smem>>
    %403 = vector.extract_strided_slice %395 {offsets = [1, 0, 0], sizes = [1, 1, 256], strides = [1, 1, 1]} : vector<2x1x256xf32> to vector<1x1x256xf32>
    %404 = vector.shape_cast %403 : vector<1x1x256xf32> to vector<1x256xf32>
    %405 = vector.broadcast %402 : f32 to vector<1x256xf32>
    %406 = arith.mulf %405, %404 : vector<1x256xf32>
    %407 = arith.addf %401, %406 : vector<1x256xf32>
    %c0_93 = arith.constant 0 : index
    %c0_94 = arith.constant 0 : index
    %c97 = arith.constant 97 : index
    %408 = vector.load %arg5[%c0_93, %c0_94, %c97] : memref<2x1x435xf32, #tpu.memory_space<vmem>>, vector<2x1x256xf32>
    %c11 = arith.constant 11 : index
    %409 = memref.load %arg1[%c11] : memref<98xf32, #tpu.memory_space<smem>>
    %410 = vector.extract_strided_slice %408 {offsets = [0, 0, 0], sizes = [1, 1, 256], strides = [1, 1, 1]} : vector<2x1x256xf32> to vector<1x1x256xf32>
    %411 = vector.shape_cast %410 : vector<1x1x256xf32> to vector<1x256xf32>
    %412 = vector.broadcast %409 : f32 to vector<1x256xf32>
    %413 = arith.mulf %412, %411 : vector<1x256xf32>
    %414 = arith.addf %407, %413 : vector<1x256xf32>
    %c60 = arith.constant 60 : index
    %415 = memref.load %arg1[%c60] : memref<98xf32, #tpu.memory_space<smem>>
    %416 = vector.extract_strided_slice %408 {offsets = [1, 0, 0], sizes = [1, 1, 256], strides = [1, 1, 1]} : vector<2x1x256xf32> to vector<1x1x256xf32>
    %417 = vector.shape_cast %416 : vector<1x1x256xf32> to vector<1x256xf32>
    %418 = vector.broadcast %415 : f32 to vector<1x256xf32>
    %419 = arith.mulf %418, %417 : vector<1x256xf32>
    %420 = arith.addf %414, %419 : vector<1x256xf32>
    %c0_95 = arith.constant 0 : index
    %c0_96 = arith.constant 0 : index
    %c113 = arith.constant 113 : index
    %421 = vector.load %arg5[%c0_95, %c0_96, %c113] : memref<2x1x435xf32, #tpu.memory_space<vmem>>, vector<2x1x256xf32>
    %c18 = arith.constant 18 : index
    %422 = memref.load %arg1[%c18] : memref<98xf32, #tpu.memory_space<smem>>
    %423 = vector.extract_strided_slice %421 {offsets = [0, 0, 0], sizes = [1, 1, 256], strides = [1, 1, 1]} : vector<2x1x256xf32> to vector<1x1x256xf32>
    %424 = vector.shape_cast %423 : vector<1x1x256xf32> to vector<1x256xf32>
    %425 = vector.broadcast %422 : f32 to vector<1x256xf32>
    %426 = arith.mulf %425, %424 : vector<1x256xf32>
    %427 = arith.addf %420, %426 : vector<1x256xf32>
    %c67 = arith.constant 67 : index
    %428 = memref.load %arg1[%c67] : memref<98xf32, #tpu.memory_space<smem>>
    %429 = vector.extract_strided_slice %421 {offsets = [1, 0, 0], sizes = [1, 1, 256], strides = [1, 1, 1]} : vector<2x1x256xf32> to vector<1x1x256xf32>
    %430 = vector.shape_cast %429 : vector<1x1x256xf32> to vector<1x256xf32>
    %431 = vector.broadcast %428 : f32 to vector<1x256xf32>
    %432 = arith.mulf %431, %430 : vector<1x256xf32>
    %433 = arith.addf %427, %432 : vector<1x256xf32>
    %c0_97 = arith.constant 0 : index
    %c0_98 = arith.constant 0 : index
    %c129 = arith.constant 129 : index
    %434 = vector.load %arg5[%c0_97, %c0_98, %c129] : memref<2x1x435xf32, #tpu.memory_space<vmem>>, vector<2x1x256xf32>
    %c25 = arith.constant 25 : index
    %435 = memref.load %arg1[%c25] : memref<98xf32, #tpu.memory_space<smem>>
    %436 = vector.extract_strided_slice %434 {offsets = [0, 0, 0], sizes = [1, 1, 256], strides = [1, 1, 1]} : vector<2x1x256xf32> to vector<1x1x256xf32>
    %437 = vector.shape_cast %436 : vector<1x1x256xf32> to vector<1x256xf32>
    %438 = vector.broadcast %435 : f32 to vector<1x256xf32>
    %439 = arith.mulf %438, %437 : vector<1x256xf32>
    %440 = arith.addf %433, %439 : vector<1x256xf32>
    %c74 = arith.constant 74 : index
    %441 = memref.load %arg1[%c74] : memref<98xf32, #tpu.memory_space<smem>>
    %442 = vector.extract_strided_slice %434 {offsets = [1, 0, 0], sizes = [1, 1, 256], strides = [1, 1, 1]} : vector<2x1x256xf32> to vector<1x1x256xf32>
    %443 = vector.shape_cast %442 : vector<1x1x256xf32> to vector<1x256xf32>
    %444 = vector.broadcast %441 : f32 to vector<1x256xf32>
    %445 = arith.mulf %444, %443 : vector<1x256xf32>
    %446 = arith.addf %440, %445 : vector<1x256xf32>
    %c0_99 = arith.constant 0 : index
    %c0_100 = arith.constant 0 : index
    %c145 = arith.constant 145 : index
    %447 = vector.load %arg5[%c0_99, %c0_100, %c145] : memref<2x1x435xf32, #tpu.memory_space<vmem>>, vector<2x1x256xf32>
    %c32 = arith.constant 32 : index
    %448 = memref.load %arg1[%c32] : memref<98xf32, #tpu.memory_space<smem>>
    %449 = vector.extract_strided_slice %447 {offsets = [0, 0, 0], sizes = [1, 1, 256], strides = [1, 1, 1]} : vector<2x1x256xf32> to vector<1x1x256xf32>
    %450 = vector.shape_cast %449 : vector<1x1x256xf32> to vector<1x256xf32>
    %451 = vector.broadcast %448 : f32 to vector<1x256xf32>
    %452 = arith.mulf %451, %450 : vector<1x256xf32>
    %453 = arith.addf %446, %452 : vector<1x256xf32>
    %c81_101 = arith.constant 81 : index
    %454 = memref.load %arg1[%c81_101] : memref<98xf32, #tpu.memory_space<smem>>
    %455 = vector.extract_strided_slice %447 {offsets = [1, 0, 0], sizes = [1, 1, 256], strides = [1, 1, 1]} : vector<2x1x256xf32> to vector<1x1x256xf32>
    %456 = vector.shape_cast %455 : vector<1x1x256xf32> to vector<1x256xf32>
    %457 = vector.broadcast %454 : f32 to vector<1x256xf32>
    %458 = arith.mulf %457, %456 : vector<1x256xf32>
    %459 = arith.addf %453, %458 : vector<1x256xf32>
    %c0_102 = arith.constant 0 : index
    %c0_103 = arith.constant 0 : index
    %c161 = arith.constant 161 : index
    %460 = vector.load %arg5[%c0_102, %c0_103, %c161] : memref<2x1x435xf32, #tpu.memory_space<vmem>>, vector<2x1x256xf32>
    %c39 = arith.constant 39 : index
    %461 = memref.load %arg1[%c39] : memref<98xf32, #tpu.memory_space<smem>>
    %462 = vector.extract_strided_slice %460 {offsets = [0, 0, 0], sizes = [1, 1, 256], strides = [1, 1, 1]} : vector<2x1x256xf32> to vector<1x1x256xf32>
    %463 = vector.shape_cast %462 : vector<1x1x256xf32> to vector<1x256xf32>
    %464 = vector.broadcast %461 : f32 to vector<1x256xf32>
    %465 = arith.mulf %464, %463 : vector<1x256xf32>
    %466 = arith.addf %459, %465 : vector<1x256xf32>
    %c88 = arith.constant 88 : index
    %467 = memref.load %arg1[%c88] : memref<98xf32, #tpu.memory_space<smem>>
    %468 = vector.extract_strided_slice %460 {offsets = [1, 0, 0], sizes = [1, 1, 256], strides = [1, 1, 1]} : vector<2x1x256xf32> to vector<1x1x256xf32>
    %469 = vector.shape_cast %468 : vector<1x1x256xf32> to vector<1x256xf32>
    %470 = vector.broadcast %467 : f32 to vector<1x256xf32>
    %471 = arith.mulf %470, %469 : vector<1x256xf32>
    %472 = arith.addf %466, %471 : vector<1x256xf32>
    %c0_104 = arith.constant 0 : index
    %c0_105 = arith.constant 0 : index
    %c177 = arith.constant 177 : index
    %473 = vector.load %arg5[%c0_104, %c0_105, %c177] : memref<2x1x435xf32, #tpu.memory_space<vmem>>, vector<2x1x256xf32>
    %c46 = arith.constant 46 : index
    %474 = memref.load %arg1[%c46] : memref<98xf32, #tpu.memory_space<smem>>
    %475 = vector.extract_strided_slice %473 {offsets = [0, 0, 0], sizes = [1, 1, 256], strides = [1, 1, 1]} : vector<2x1x256xf32> to vector<1x1x256xf32>
    %476 = vector.shape_cast %475 : vector<1x1x256xf32> to vector<1x256xf32>
    %477 = vector.broadcast %474 : f32 to vector<1x256xf32>
    %478 = arith.mulf %477, %476 : vector<1x256xf32>
    %479 = arith.addf %472, %478 : vector<1x256xf32>
    %c95_106 = arith.constant 95 : index
    %480 = memref.load %arg1[%c95_106] : memref<98xf32, #tpu.memory_space<smem>>
    %481 = vector.extract_strided_slice %473 {offsets = [1, 0, 0], sizes = [1, 1, 256], strides = [1, 1, 1]} : vector<2x1x256xf32> to vector<1x1x256xf32>
    %482 = vector.shape_cast %481 : vector<1x1x256xf32> to vector<1x256xf32>
    %483 = vector.broadcast %480 : f32 to vector<1x256xf32>
    %484 = arith.mulf %483, %482 : vector<1x256xf32>
    %485 = arith.addf %479, %484 : vector<1x256xf32>
    %c4_107 = arith.constant 4 : index
    %c0_108 = arith.constant 0 : index
    %486 = vector.load %arg2[%c4_107, %c0_108] : memref<7x256xf32, #tpu.memory_space<vmem>>, vector<1x256xf32>
    %487 = arith.mulf %486, %485 : vector<1x256xf32>
    %488 = arith.addf %393, %487 : vector<1x256xf32>
    %cst_109 = arith.constant 0.000000e+00 : f32
    %489 = vector.broadcast %cst_109 : f32 to vector<1x256xf32>
    %c0_110 = arith.constant 0 : index
    %c0_111 = arith.constant 0 : index
    %c82 = arith.constant 82 : index
    %490 = vector.load %arg5[%c0_110, %c0_111, %c82] : memref<2x1x435xf32, #tpu.memory_space<vmem>>, vector<2x1x256xf32>
    %c5 = arith.constant 5 : index
    %491 = memref.load %arg1[%c5] : memref<98xf32, #tpu.memory_space<smem>>
    %492 = vector.extract_strided_slice %490 {offsets = [0, 0, 0], sizes = [1, 1, 256], strides = [1, 1, 1]} : vector<2x1x256xf32> to vector<1x1x256xf32>
    %493 = vector.shape_cast %492 : vector<1x1x256xf32> to vector<1x256xf32>
    %494 = vector.broadcast %491 : f32 to vector<1x256xf32>
    %495 = arith.mulf %494, %493 : vector<1x256xf32>
    %496 = arith.addf %489, %495 : vector<1x256xf32>
    %c54 = arith.constant 54 : index
    %497 = memref.load %arg1[%c54] : memref<98xf32, #tpu.memory_space<smem>>
    %498 = vector.extract_strided_slice %490 {offsets = [1, 0, 0], sizes = [1, 1, 256], strides = [1, 1, 1]} : vector<2x1x256xf32> to vector<1x1x256xf32>
    %499 = vector.shape_cast %498 : vector<1x1x256xf32> to vector<1x256xf32>
    %500 = vector.broadcast %497 : f32 to vector<1x256xf32>
    %501 = arith.mulf %500, %499 : vector<1x256xf32>
    %502 = arith.addf %496, %501 : vector<1x256xf32>
    %c0_112 = arith.constant 0 : index
    %c0_113 = arith.constant 0 : index
    %c98 = arith.constant 98 : index
    %503 = vector.load %arg5[%c0_112, %c0_113, %c98] : memref<2x1x435xf32, #tpu.memory_space<vmem>>, vector<2x1x256xf32>
    %c12 = arith.constant 12 : index
    %504 = memref.load %arg1[%c12] : memref<98xf32, #tpu.memory_space<smem>>
    %505 = vector.extract_strided_slice %503 {offsets = [0, 0, 0], sizes = [1, 1, 256], strides = [1, 1, 1]} : vector<2x1x256xf32> to vector<1x1x256xf32>
    %506 = vector.shape_cast %505 : vector<1x1x256xf32> to vector<1x256xf32>
    %507 = vector.broadcast %504 : f32 to vector<1x256xf32>
    %508 = arith.mulf %507, %506 : vector<1x256xf32>
    %509 = arith.addf %502, %508 : vector<1x256xf32>
    %c61 = arith.constant 61 : index
    %510 = memref.load %arg1[%c61] : memref<98xf32, #tpu.memory_space<smem>>
    %511 = vector.extract_strided_slice %503 {offsets = [1, 0, 0], sizes = [1, 1, 256], strides = [1, 1, 1]} : vector<2x1x256xf32> to vector<1x1x256xf32>
    %512 = vector.shape_cast %511 : vector<1x1x256xf32> to vector<1x256xf32>
    %513 = vector.broadcast %510 : f32 to vector<1x256xf32>
    %514 = arith.mulf %513, %512 : vector<1x256xf32>
    %515 = arith.addf %509, %514 : vector<1x256xf32>
    %c0_114 = arith.constant 0 : index
    %c0_115 = arith.constant 0 : index
    %c114 = arith.constant 114 : index
    %516 = vector.load %arg5[%c0_114, %c0_115, %c114] : memref<2x1x435xf32, #tpu.memory_space<vmem>>, vector<2x1x256xf32>
    %c19 = arith.constant 19 : index
    %517 = memref.load %arg1[%c19] : memref<98xf32, #tpu.memory_space<smem>>
    %518 = vector.extract_strided_slice %516 {offsets = [0, 0, 0], sizes = [1, 1, 256], strides = [1, 1, 1]} : vector<2x1x256xf32> to vector<1x1x256xf32>
    %519 = vector.shape_cast %518 : vector<1x1x256xf32> to vector<1x256xf32>
    %520 = vector.broadcast %517 : f32 to vector<1x256xf32>
    %521 = arith.mulf %520, %519 : vector<1x256xf32>
    %522 = arith.addf %515, %521 : vector<1x256xf32>
    %c68 = arith.constant 68 : index
    %523 = memref.load %arg1[%c68] : memref<98xf32, #tpu.memory_space<smem>>
    %524 = vector.extract_strided_slice %516 {offsets = [1, 0, 0], sizes = [1, 1, 256], strides = [1, 1, 1]} : vector<2x1x256xf32> to vector<1x1x256xf32>
    %525 = vector.shape_cast %524 : vector<1x1x256xf32> to vector<1x256xf32>
    %526 = vector.broadcast %523 : f32 to vector<1x256xf32>
    %527 = arith.mulf %526, %525 : vector<1x256xf32>
    %528 = arith.addf %522, %527 : vector<1x256xf32>
    %c0_116 = arith.constant 0 : index
    %c0_117 = arith.constant 0 : index
    %c130 = arith.constant 130 : index
    %529 = vector.load %arg5[%c0_116, %c0_117, %c130] : memref<2x1x435xf32, #tpu.memory_space<vmem>>, vector<2x1x256xf32>
    %c26 = arith.constant 26 : index
    %530 = memref.load %arg1[%c26] : memref<98xf32, #tpu.memory_space<smem>>
    %531 = vector.extract_strided_slice %529 {offsets = [0, 0, 0], sizes = [1, 1, 256], strides = [1, 1, 1]} : vector<2x1x256xf32> to vector<1x1x256xf32>
    %532 = vector.shape_cast %531 : vector<1x1x256xf32> to vector<1x256xf32>
    %533 = vector.broadcast %530 : f32 to vector<1x256xf32>
    %534 = arith.mulf %533, %532 : vector<1x256xf32>
    %535 = arith.addf %528, %534 : vector<1x256xf32>
    %c75 = arith.constant 75 : index
    %536 = memref.load %arg1[%c75] : memref<98xf32, #tpu.memory_space<smem>>
    %537 = vector.extract_strided_slice %529 {offsets = [1, 0, 0], sizes = [1, 1, 256], strides = [1, 1, 1]} : vector<2x1x256xf32> to vector<1x1x256xf32>
    %538 = vector.shape_cast %537 : vector<1x1x256xf32> to vector<1x256xf32>
    %539 = vector.broadcast %536 : f32 to vector<1x256xf32>
    %540 = arith.mulf %539, %538 : vector<1x256xf32>
    %541 = arith.addf %535, %540 : vector<1x256xf32>
    %c0_118 = arith.constant 0 : index
    %c0_119 = arith.constant 0 : index
    %c146 = arith.constant 146 : index
    %542 = vector.load %arg5[%c0_118, %c0_119, %c146] : memref<2x1x435xf32, #tpu.memory_space<vmem>>, vector<2x1x256xf32>
    %c33 = arith.constant 33 : index
    %543 = memref.load %arg1[%c33] : memref<98xf32, #tpu.memory_space<smem>>
    %544 = vector.extract_strided_slice %542 {offsets = [0, 0, 0], sizes = [1, 1, 256], strides = [1, 1, 1]} : vector<2x1x256xf32> to vector<1x1x256xf32>
    %545 = vector.shape_cast %544 : vector<1x1x256xf32> to vector<1x256xf32>
    %546 = vector.broadcast %543 : f32 to vector<1x256xf32>
    %547 = arith.mulf %546, %545 : vector<1x256xf32>
    %548 = arith.addf %541, %547 : vector<1x256xf32>
    %c82_120 = arith.constant 82 : index
    %549 = memref.load %arg1[%c82_120] : memref<98xf32, #tpu.memory_space<smem>>
    %550 = vector.extract_strided_slice %542 {offsets = [1, 0, 0], sizes = [1, 1, 256], strides = [1, 1, 1]} : vector<2x1x256xf32> to vector<1x1x256xf32>
    %551 = vector.shape_cast %550 : vector<1x1x256xf32> to vector<1x256xf32>
    %552 = vector.broadcast %549 : f32 to vector<1x256xf32>
    %553 = arith.mulf %552, %551 : vector<1x256xf32>
    %554 = arith.addf %548, %553 : vector<1x256xf32>
    %c0_121 = arith.constant 0 : index
    %c0_122 = arith.constant 0 : index
    %c162 = arith.constant 162 : index
    %555 = vector.load %arg5[%c0_121, %c0_122, %c162] : memref<2x1x435xf32, #tpu.memory_space<vmem>>, vector<2x1x256xf32>
    %c40 = arith.constant 40 : index
    %556 = memref.load %arg1[%c40] : memref<98xf32, #tpu.memory_space<smem>>
    %557 = vector.extract_strided_slice %555 {offsets = [0, 0, 0], sizes = [1, 1, 256], strides = [1, 1, 1]} : vector<2x1x256xf32> to vector<1x1x256xf32>
    %558 = vector.shape_cast %557 : vector<1x1x256xf32> to vector<1x256xf32>
    %559 = vector.broadcast %556 : f32 to vector<1x256xf32>
    %560 = arith.mulf %559, %558 : vector<1x256xf32>
    %561 = arith.addf %554, %560 : vector<1x256xf32>
    %c89 = arith.constant 89 : index
    %562 = memref.load %arg1[%c89] : memref<98xf32, #tpu.memory_space<smem>>
    %563 = vector.extract_strided_slice %555 {offsets = [1, 0, 0], sizes = [1, 1, 256], strides = [1, 1, 1]} : vector<2x1x256xf32> to vector<1x1x256xf32>
    %564 = vector.shape_cast %563 : vector<1x1x256xf32> to vector<1x256xf32>
    %565 = vector.broadcast %562 : f32 to vector<1x256xf32>
    %566 = arith.mulf %565, %564 : vector<1x256xf32>
    %567 = arith.addf %561, %566 : vector<1x256xf32>
    %c0_123 = arith.constant 0 : index
    %c0_124 = arith.constant 0 : index
    %c178 = arith.constant 178 : index
    %568 = vector.load %arg5[%c0_123, %c0_124, %c178] : memref<2x1x435xf32, #tpu.memory_space<vmem>>, vector<2x1x256xf32>
    %c47 = arith.constant 47 : index
    %569 = memref.load %arg1[%c47] : memref<98xf32, #tpu.memory_space<smem>>
    %570 = vector.extract_strided_slice %568 {offsets = [0, 0, 0], sizes = [1, 1, 256], strides = [1, 1, 1]} : vector<2x1x256xf32> to vector<1x1x256xf32>
    %571 = vector.shape_cast %570 : vector<1x1x256xf32> to vector<1x256xf32>
    %572 = vector.broadcast %569 : f32 to vector<1x256xf32>
    %573 = arith.mulf %572, %571 : vector<1x256xf32>
    %574 = arith.addf %567, %573 : vector<1x256xf32>
    %c96_125 = arith.constant 96 : index
    %575 = memref.load %arg1[%c96_125] : memref<98xf32, #tpu.memory_space<smem>>
    %576 = vector.extract_strided_slice %568 {offsets = [1, 0, 0], sizes = [1, 1, 256], strides = [1, 1, 1]} : vector<2x1x256xf32> to vector<1x1x256xf32>
    %577 = vector.shape_cast %576 : vector<1x1x256xf32> to vector<1x256xf32>
    %578 = vector.broadcast %575 : f32 to vector<1x256xf32>
    %579 = arith.mulf %578, %577 : vector<1x256xf32>
    %580 = arith.addf %574, %579 : vector<1x256xf32>
    %c5_126 = arith.constant 5 : index
    %c0_127 = arith.constant 0 : index
    %581 = vector.load %arg2[%c5_126, %c0_127] : memref<7x256xf32, #tpu.memory_space<vmem>>, vector<1x256xf32>
    %582 = arith.mulf %581, %580 : vector<1x256xf32>
    %583 = arith.addf %488, %582 : vector<1x256xf32>
    %cst_128 = arith.constant 0.000000e+00 : f32
    %584 = vector.broadcast %cst_128 : f32 to vector<1x256xf32>
    %c0_129 = arith.constant 0 : index
    %c0_130 = arith.constant 0 : index
    %c83 = arith.constant 83 : index
    %585 = vector.load %arg5[%c0_129, %c0_130, %c83] : memref<2x1x435xf32, #tpu.memory_space<vmem>>, vector<2x1x256xf32>
    %c6 = arith.constant 6 : index
    %586 = memref.load %arg1[%c6] : memref<98xf32, #tpu.memory_space<smem>>
    %587 = vector.extract_strided_slice %585 {offsets = [0, 0, 0], sizes = [1, 1, 256], strides = [1, 1, 1]} : vector<2x1x256xf32> to vector<1x1x256xf32>
    %588 = vector.shape_cast %587 : vector<1x1x256xf32> to vector<1x256xf32>
    %589 = vector.broadcast %586 : f32 to vector<1x256xf32>
    %590 = arith.mulf %589, %588 : vector<1x256xf32>
    %591 = arith.addf %584, %590 : vector<1x256xf32>
    %c55 = arith.constant 55 : index
    %592 = memref.load %arg1[%c55] : memref<98xf32, #tpu.memory_space<smem>>
    %593 = vector.extract_strided_slice %585 {offsets = [1, 0, 0], sizes = [1, 1, 256], strides = [1, 1, 1]} : vector<2x1x256xf32> to vector<1x1x256xf32>
    %594 = vector.shape_cast %593 : vector<1x1x256xf32> to vector<1x256xf32>
    %595 = vector.broadcast %592 : f32 to vector<1x256xf32>
    %596 = arith.mulf %595, %594 : vector<1x256xf32>
    %597 = arith.addf %591, %596 : vector<1x256xf32>
    %c0_131 = arith.constant 0 : index
    %c0_132 = arith.constant 0 : index
    %c99 = arith.constant 99 : index
    %598 = vector.load %arg5[%c0_131, %c0_132, %c99] : memref<2x1x435xf32, #tpu.memory_space<vmem>>, vector<2x1x256xf32>
    %c13 = arith.constant 13 : index
    %599 = memref.load %arg1[%c13] : memref<98xf32, #tpu.memory_space<smem>>
    %600 = vector.extract_strided_slice %598 {offsets = [0, 0, 0], sizes = [1, 1, 256], strides = [1, 1, 1]} : vector<2x1x256xf32> to vector<1x1x256xf32>
    %601 = vector.shape_cast %600 : vector<1x1x256xf32> to vector<1x256xf32>
    %602 = vector.broadcast %599 : f32 to vector<1x256xf32>
    %603 = arith.mulf %602, %601 : vector<1x256xf32>
    %604 = arith.addf %597, %603 : vector<1x256xf32>
    %c62 = arith.constant 62 : index
    %605 = memref.load %arg1[%c62] : memref<98xf32, #tpu.memory_space<smem>>
    %606 = vector.extract_strided_slice %598 {offsets = [1, 0, 0], sizes = [1, 1, 256], strides = [1, 1, 1]} : vector<2x1x256xf32> to vector<1x1x256xf32>
    %607 = vector.shape_cast %606 : vector<1x1x256xf32> to vector<1x256xf32>
    %608 = vector.broadcast %605 : f32 to vector<1x256xf32>
    %609 = arith.mulf %608, %607 : vector<1x256xf32>
    %610 = arith.addf %604, %609 : vector<1x256xf32>
    %c0_133 = arith.constant 0 : index
    %c0_134 = arith.constant 0 : index
    %c115 = arith.constant 115 : index
    %611 = vector.load %arg5[%c0_133, %c0_134, %c115] : memref<2x1x435xf32, #tpu.memory_space<vmem>>, vector<2x1x256xf32>
    %c20 = arith.constant 20 : index
    %612 = memref.load %arg1[%c20] : memref<98xf32, #tpu.memory_space<smem>>
    %613 = vector.extract_strided_slice %611 {offsets = [0, 0, 0], sizes = [1, 1, 256], strides = [1, 1, 1]} : vector<2x1x256xf32> to vector<1x1x256xf32>
    %614 = vector.shape_cast %613 : vector<1x1x256xf32> to vector<1x256xf32>
    %615 = vector.broadcast %612 : f32 to vector<1x256xf32>
    %616 = arith.mulf %615, %614 : vector<1x256xf32>
    %617 = arith.addf %610, %616 : vector<1x256xf32>
    %c69 = arith.constant 69 : index
    %618 = memref.load %arg1[%c69] : memref<98xf32, #tpu.memory_space<smem>>
    %619 = vector.extract_strided_slice %611 {offsets = [1, 0, 0], sizes = [1, 1, 256], strides = [1, 1, 1]} : vector<2x1x256xf32> to vector<1x1x256xf32>
    %620 = vector.shape_cast %619 : vector<1x1x256xf32> to vector<1x256xf32>
    %621 = vector.broadcast %618 : f32 to vector<1x256xf32>
    %622 = arith.mulf %621, %620 : vector<1x256xf32>
    %623 = arith.addf %617, %622 : vector<1x256xf32>
    %c0_135 = arith.constant 0 : index
    %c0_136 = arith.constant 0 : index
    %c131 = arith.constant 131 : index
    %624 = vector.load %arg5[%c0_135, %c0_136, %c131] : memref<2x1x435xf32, #tpu.memory_space<vmem>>, vector<2x1x256xf32>
    %c27 = arith.constant 27 : index
    %625 = memref.load %arg1[%c27] : memref<98xf32, #tpu.memory_space<smem>>
    %626 = vector.extract_strided_slice %624 {offsets = [0, 0, 0], sizes = [1, 1, 256], strides = [1, 1, 1]} : vector<2x1x256xf32> to vector<1x1x256xf32>
    %627 = vector.shape_cast %626 : vector<1x1x256xf32> to vector<1x256xf32>
    %628 = vector.broadcast %625 : f32 to vector<1x256xf32>
    %629 = arith.mulf %628, %627 : vector<1x256xf32>
    %630 = arith.addf %623, %629 : vector<1x256xf32>
    %c76 = arith.constant 76 : index
    %631 = memref.load %arg1[%c76] : memref<98xf32, #tpu.memory_space<smem>>
    %632 = vector.extract_strided_slice %624 {offsets = [1, 0, 0], sizes = [1, 1, 256], strides = [1, 1, 1]} : vector<2x1x256xf32> to vector<1x1x256xf32>
    %633 = vector.shape_cast %632 : vector<1x1x256xf32> to vector<1x256xf32>
    %634 = vector.broadcast %631 : f32 to vector<1x256xf32>
    %635 = arith.mulf %634, %633 : vector<1x256xf32>
    %636 = arith.addf %630, %635 : vector<1x256xf32>
    %c0_137 = arith.constant 0 : index
    %c0_138 = arith.constant 0 : index
    %c147 = arith.constant 147 : index
    %637 = vector.load %arg5[%c0_137, %c0_138, %c147] : memref<2x1x435xf32, #tpu.memory_space<vmem>>, vector<2x1x256xf32>
    %c34 = arith.constant 34 : index
    %638 = memref.load %arg1[%c34] : memref<98xf32, #tpu.memory_space<smem>>
    %639 = vector.extract_strided_slice %637 {offsets = [0, 0, 0], sizes = [1, 1, 256], strides = [1, 1, 1]} : vector<2x1x256xf32> to vector<1x1x256xf32>
    %640 = vector.shape_cast %639 : vector<1x1x256xf32> to vector<1x256xf32>
    %641 = vector.broadcast %638 : f32 to vector<1x256xf32>
    %642 = arith.mulf %641, %640 : vector<1x256xf32>
    %643 = arith.addf %636, %642 : vector<1x256xf32>
    %c83_139 = arith.constant 83 : index
    %644 = memref.load %arg1[%c83_139] : memref<98xf32, #tpu.memory_space<smem>>
    %645 = vector.extract_strided_slice %637 {offsets = [1, 0, 0], sizes = [1, 1, 256], strides = [1, 1, 1]} : vector<2x1x256xf32> to vector<1x1x256xf32>
    %646 = vector.shape_cast %645 : vector<1x1x256xf32> to vector<1x256xf32>
    %647 = vector.broadcast %644 : f32 to vector<1x256xf32>
    %648 = arith.mulf %647, %646 : vector<1x256xf32>
    %649 = arith.addf %643, %648 : vector<1x256xf32>
    %c0_140 = arith.constant 0 : index
    %c0_141 = arith.constant 0 : index
    %c163 = arith.constant 163 : index
    %650 = vector.load %arg5[%c0_140, %c0_141, %c163] : memref<2x1x435xf32, #tpu.memory_space<vmem>>, vector<2x1x256xf32>
    %c41 = arith.constant 41 : index
    %651 = memref.load %arg1[%c41] : memref<98xf32, #tpu.memory_space<smem>>
    %652 = vector.extract_strided_slice %650 {offsets = [0, 0, 0], sizes = [1, 1, 256], strides = [1, 1, 1]} : vector<2x1x256xf32> to vector<1x1x256xf32>
    %653 = vector.shape_cast %652 : vector<1x1x256xf32> to vector<1x256xf32>
    %654 = vector.broadcast %651 : f32 to vector<1x256xf32>
    %655 = arith.mulf %654, %653 : vector<1x256xf32>
    %656 = arith.addf %649, %655 : vector<1x256xf32>
    %c90 = arith.constant 90 : index
    %657 = memref.load %arg1[%c90] : memref<98xf32, #tpu.memory_space<smem>>
    %658 = vector.extract_strided_slice %650 {offsets = [1, 0, 0], sizes = [1, 1, 256], strides = [1, 1, 1]} : vector<2x1x256xf32> to vector<1x1x256xf32>
    %659 = vector.shape_cast %658 : vector<1x1x256xf32> to vector<1x256xf32>
    %660 = vector.broadcast %657 : f32 to vector<1x256xf32>
    %661 = arith.mulf %660, %659 : vector<1x256xf32>
    %662 = arith.addf %656, %661 : vector<1x256xf32>
    %c0_142 = arith.constant 0 : index
    %c0_143 = arith.constant 0 : index
    %c179 = arith.constant 179 : index
    %663 = vector.load %arg5[%c0_142, %c0_143, %c179] : memref<2x1x435xf32, #tpu.memory_space<vmem>>, vector<2x1x256xf32>
    %c48 = arith.constant 48 : index
    %664 = memref.load %arg1[%c48] : memref<98xf32, #tpu.memory_space<smem>>
    %665 = vector.extract_strided_slice %663 {offsets = [0, 0, 0], sizes = [1, 1, 256], strides = [1, 1, 1]} : vector<2x1x256xf32> to vector<1x1x256xf32>
    %666 = vector.shape_cast %665 : vector<1x1x256xf32> to vector<1x256xf32>
    %667 = vector.broadcast %664 : f32 to vector<1x256xf32>
    %668 = arith.mulf %667, %666 : vector<1x256xf32>
    %669 = arith.addf %662, %668 : vector<1x256xf32>
    %c97_144 = arith.constant 97 : index
    %670 = memref.load %arg1[%c97_144] : memref<98xf32, #tpu.memory_space<smem>>
    %671 = vector.extract_strided_slice %663 {offsets = [1, 0, 0], sizes = [1, 1, 256], strides = [1, 1, 1]} : vector<2x1x256xf32> to vector<1x1x256xf32>
    %672 = vector.shape_cast %671 : vector<1x1x256xf32> to vector<1x256xf32>
    %673 = vector.broadcast %670 : f32 to vector<1x256xf32>
    %674 = arith.mulf %673, %672 : vector<1x256xf32>
    %675 = arith.addf %669, %674 : vector<1x256xf32>
    %c6_145 = arith.constant 6 : index
    %c0_146 = arith.constant 0 : index
    %676 = vector.load %arg2[%c6_145, %c0_146] : memref<7x256xf32, #tpu.memory_space<vmem>>, vector<1x256xf32>
    %677 = arith.mulf %676, %675 : vector<1x256xf32>
    %678 = arith.addf %583, %677 : vector<1x256xf32>
    %cst_147 = arith.constant 5.000000e-01 : f32
    %679 = vector.broadcast %cst_147 : f32 to vector<1x256xf32>
    %680 = arith.mulf %679, %678 : vector<1x256xf32>
    %681 = math.tanh %680 : vector<1x256xf32>
    %cst_148 = arith.constant 5.000000e-01 : f32
    %682 = vector.broadcast %cst_148 : f32 to vector<1x256xf32>
    %683 = arith.mulf %682, %681 : vector<1x256xf32>
    %cst_149 = arith.constant 5.000000e-01 : f32
    %684 = vector.broadcast %cst_149 : f32 to vector<1x256xf32>
    %685 = arith.addf %683, %684 : vector<1x256xf32>
    %c0_150 = arith.constant 0 : index
    %c0_151 = arith.constant 0 : index
    %c0_152 = arith.constant 0 : index
    %686 = vector.load %arg3[%c0_150, %c0_151, %c0_152] : memref<1x4x256xf32, #tpu.memory_space<vmem>>, vector<1x4x256xf32>
    %687 = vector.shape_cast %685 : vector<1x256xf32> to vector<1x1x256xf32>
    %688 = vector.broadcast %687 : vector<1x1x256xf32> to vector<1x4x256xf32>
    %689 = arith.mulf %686, %688 : vector<1x4x256xf32>
    %c0_153 = arith.constant 0 : index
    %c0_154 = arith.constant 0 : index
    %c0_155 = arith.constant 0 : index
    %690 = vector.load %arg4[%c0_153, %c0_154, %c0_155] : memref<1x4x256xf32, #tpu.memory_space<vmem>>, vector<1x4x256xf32>
    tpu.vector_store %arg4[%c0_153, %c0_154, %c0_155], %689 {strides = array<i32>} : memref<1x4x256xf32, #tpu.memory_space<vmem>>, vector<1x4x256xf32>,
    return
  }
  func.func @transform_0(%arg0: i32) -> i32 {
    %c0_i32 = arith.constant 0 : i32
    %c0_i32_0 = arith.constant 0 : i32
    return %c0_i32 : i32
  }
  func.func @transform_1(%arg0: i32) -> (i32, i32) {
    %c0_i32 = arith.constant 0 : i32
    %c0_i32_0 = arith.constant 0 : i32
    %c0_i32_1 = arith.constant 0 : i32
    return %c0_i32, %c0_i32_0 : i32, i32
  }
  func.func @transform_2(%arg0: i32) -> (i32, i32, i32) {
    %c0_i32 = arith.constant 0 : i32
    %c0_i32_0 = arith.constant 0 : i32
    %c0_i32_1 = arith.constant 0 : i32
    return %arg0, %c0_i32, %c0_i32_0 : i32, i32, i32
  }
  func.func @transform_3(%arg0: i32) -> (i32, i32, i32) {
    %c0_i32 = arith.constant 0 : i32
    %c0_i32_0 = arith.constant 0 : i32
    %c0_i32_1 = arith.constant 0 : i32
    return %arg0, %c0_i32, %c0_i32_0 : i32, i32, i32
  }
}

</mosaic_0001>

<bundles_post_ra>
// kernel: tpu_custom_call.1
= control target key start
LH: loop header
LB: loop body
LE: loop exit
PB: predicated region body
PF: predicated region fallthrough
CT: control target
= control target key end

     0   :  { %8 = vsyncpa [#allocation6], 0  ;;  %s2445_s0 = inlined_call_operand.hbm [shape: f32[98], index: 0, kind: input, shape index: {}]   ;;  %s2446_s1 = inlined_call_operand.hbm [shape: f32[7,256], index: 1, kind: input, shape index: {}]   ;;  %s2447_s2 = inlined_call_operand.hbm [shape: f32[2,4,256], index: 2, kind: input, shape index: {}]   ;;  %s2448_s3 = inlined_call_operand.hbm [shape: f32[2,4,256], index: 3, kind: output, shape index: {}]  }
   0x1   :  { %9 = vsyncpa [#allocation4], 0 }
   0x2   :  { %10 = vsyncpa [#allocation9], 0 }
   0x3   :  { %12 = vsyncpa [#allocation9 + $0x1], 0 }
   0x4   :  { %13 = vsyncpa [#allocation5], 0 }
   0x5   :  { %15 = vsyncpa [#allocation5 + $0x1], 0  ;;  %s1779_s12 = smov 0   ;;  %s1781_s13 = smov 0  }
   0x6   :  { %s1783_s14 = smov 0   ;;  %s1785_s15 = smov 0  }
   0x7 LB: > { %s1800_s16 = sadd.s32 4294967295, %s1742_s15   ;;  %s1390_s17 = sadd.s32 4294967294, %s1742_s15   ;;  %s1742_s15 = sphi %s1785_s15, %s2460_s15   ;;  %s1738_s14 = sphi %s1783_s14, %s2459_s14   ;;  %s1734_s13 = sphi %s1781_s13, %s2458_s13   ;;  %s1730_s12 = sphi %s1779_s12, %s2457_s12  }
   0x8   : > { %p83_p0 = scmp.ne.s32.totalorder %s1734_s13, %s1730_s12  ;;  %p84_p1 = scmp.eq.s32.totalorder %s1800_s16, 0 }
   0x9   : > { %p107_p2 = scmp.eq.s32.totalorder %s1800_s16, 1  ;;  %p113_p3 = scmp.eq.s32.totalorder %s1390_s17, 1 }
   0xa   : > { %p1809_p4 = por %p84_p1, %p83_p0  ;;  %p1391_p5 = scmp.ge.s32.totalorder %s1742_s15, 1 }
   0xb   : > { %p1814_p6 = por %p113_p3, %p83_p0  ;;  %p120_p7 = scmp.lt.s32.totalorder %s1742_s15, 3 }
   0xc   : > { %s132_s22 = sshll.u32 %s2445_s0, 4  ;;  %s142_s26 = sshll.u32 %s2446_s1, 4  ;;  %s133_s22 = int_to_ptr.hbm [resolvable:$true] %s132_s22  ;;  %s143_s26 = int_to_ptr.hbm [resolvable:$true] %s142_s26 }
   0xd   : > { %p1822_p8 = pnand %p1391_p5, %p120_p7  ;;  %s1744_s27 = smov [#allocation7]  }
   0xe   : > { %s144_s28 = sshll.u32 %s1744_s27, 4  ;;  %s1745_s29 = smov [#allocation3]   ;;  %s145_s28 = int_to_ptr.vmem [resolvable:$true] %s144_s28 }
   0xf   : > { %p1519_p10 = pneg %p1822_p8  ;;  %s1835_s30 = sadd.s32 1, %s1742_s15  }
  0x10   : > { %s70_s4 = sadd.s32 1, %s1738_s14  ;;  %s67_s5 = ssub.s32 %s1742_s15, %s1835_s30 }
  0x11   : > { %p1520_p11 = pnand %p1519_p10, %p84_p1  ;;  %p77_p12 = scmp.ne.s32.totalorder %s1738_s14, %s1734_s13 }
  0x12   : > { %p68_p13 = scmp.eq.s32.totalorder %s67_s5, 0  ;;  %p78_p0 = scmp.eq.s32.totalorder %s1742_s15, 0 }
  0x13   : > { %1522 = dma.hbm_to_smem (!%p1520_p11), %s133_s22, 16, %s1745_s29, [#allocation6]  }
  0x14   : > { %1525 = dma.hbm_to_vmem [thread:$0]  (!%p1520_p11), %s143_s26, 256, %s145_s28, [#allocation4]  }
  0x15   : > { %p1845_p3 = por %p107_p2, %p77_p12  ;;  %p1536_p5 = scmp.lt.s32.totalorder %s1742_s15, 2 }
  0x16   : > { %s1851_s7 = scalar_select %p68_p13, %s1738_s14, %s70_s4  }
  0x17   : > { %p79_p7 = por %p78_p0, %p77_p12  ;;  %s155_s8 = sand.u32 1, %s1738_s14  }
  0x18   : > { %s1395_s9 = sshll.u32 %s155_s8, 3  ;;  %s1505_s10 = sshll.u32 %s1742_s15, 3 }
  0x19   : > { %s164_s20 = scalar_lea.hbm %s2447_s2, %s1505_s10  ;;  %s159_s21 = scalar_lea.vmem [#allocation8], %s1395_s9 }
  0x1a   : > { %s168_s22 = sshll.u32 %s159_s21, 4  ;;  %s166_s24 = sshll.u32 %s164_s20, 4  ;;  %s169_s22 = int_to_ptr.vmem [resolvable:$true] %s168_s22  ;;  %s167_s24 = int_to_ptr.hbm [resolvable:$true] %s166_s24 }
  0x1b   : > { %p1858_p2 = pnand %p1536_p5, %p79_p7  ;;  %s156_s26 = scalar_lea.sflag [#allocation9], %s155_s8 }
  0x1c   : > { %s1638_s27 = sshra.s32 %s167_s24, 4  ;;  %s1645_s5 = scalar_lea.hbm %s2447_s2, 16  ;;  %s1639_s27 = int_to_ptr.hbm [resolvable:$true] %s1638_s27 }
  0x1d   : > { %s1640_s28 = scalar_lea.hbm %s1639_s27, 8  ;;  %p1642_p11 = pneg %p1858_p2 }
  0x1e   : > { %p1641_p10 = scmp.ne.s32.totalorder %s1639_s27, %s1640_s28  ;;  %p1646_p0 = scmp.lt.s32.totalorder %s1639_s27, %s2447_s2 }
  0x1f   : > { %p1647_p5 = scmp.lt.s32.totalorder %s1645_s5, %s1640_s28 }
  0x20   : > { %p1643_p12 = pnand %p1642_p11, %p1641_p10 }
  0x21   : > { %p1648_p7 = por %p1647_p5, %p1646_p0 }
  0x22   : > { %p1644_p13 = pneg %p1643_p12 }
  0x24   : > { %p1649_p9 = pnand %p1648_p7, %p1644_p13 }
  0x26   : > { %1652 = shalt.err (!%p1649_p9)
}
  0x27   : > { %1529 = dma.hbm_to_vmem [thread:$0]  (!%p1858_p2), %s167_s24, 128, %s169_s22, %s156_s26  }
  0x28   : > { %177 = sbr.rel (%p1822_p8) target bundleno = 590 (0x24e), region = 32 }
  0x2d   : > { %1713 = dma.done.wait (%p84_p1), [#allocation6], 16  }
  0x2e   : > { %1715 = vsyncadd (%p84_p1), [#allocation6], 4294967280 }
  0x2f   : > { %1717 = dma.done.wait (%p84_p1), [#allocation4], 256  }
  0x30   : > { %1719 = vsyncadd (%p84_p1), [#allocation4], 4294967040  ;;  %s1883_s8 = sand.u32 1, %s1734_s13  }
  0x31   : > { %s1401_s23 = sshll.u32 %s1883_s8, 3  ;;  %s190_s11 = scalar_lea.sflag [#allocation9], %s1883_s8 }
  0x32   : > { %s1889_s17 = scalar_lea.vmem [#allocation8], %s1401_s23 }
  0x33   : > { %1721 = dma.done.wait (%p1809_p4), %s190_s11, 128  }
  0x34   : > { %1723 = vsyncadd (%p1809_p4), %s190_s11, 4294967168 }
  0x35   : > { %199 = sfence }
  0x36   : > { %v218_v0 = vld [vmem:[%s1889_s17] sm:$0xff]  ;;  %v261_v1 = vlaneseq  ;;  %v1746_v2 = vmov 0.0   ;;  %vm225_vm1 = vcmask 1043456   ;;  %s1406_s18 = sld [smem:[#allocation3 + $0xe]]  ;;  %vm270_vm2 = vcmask 1040384   ;;  %s1747_s26 = smov 96  }
  0x37   : > { %220 = vst [vmem:[#allocation1] ss:$2 sm:$0xff] %v218_v0  ;;  %s1404_s20 = sld [smem:[#allocation3 + $0x7]]  ;;  %s1748_s27 = smov 112   ;;  %vm300_vm4 = vcmask 916480   ;;  %vm321_vm5 = vcmask 785408  }
  0x38   : > { %vm263_vm0 = vcmp.lt.s32.totalorder %v261_v1, 435  ;;  %vm1900_vm3 = vcmp.lt.s32.totalorder %v261_v1, 256  ;;  %s1408_s21 = sld [smem:[#allocation3 + $0x15]]  ;;  %s1749_s29 = smov 80   ;;  %vm342_vm6 = vcmask 654336   ;;  %vm365_vm7 = vcmask 523264  }
  0x39   : > { %265 = vst.msk [vmem:[#allocation2] sm:$0xf] %vm263_vm0, %v1746_v2  ;;  %s1414_s22 = sld [smem:[#allocation3 + $0x2a]]  ;;  %s1750_s9 = smov 32   ;;  %vm386_vm8 = vcmask 392192   ;;  %vm407_vm9 = vcmask 261120  }
  0x3a   : > { %266 = vst.msk [vmem:[#allocation2 + $0x4] sm:$0xf] %vm263_vm0, %v1746_v2  ;;  %s1410_s24 = sld [smem:[#allocation3 + $0x1c]]  ;;  %s1751_s10 = smov 64   ;;  %vm426_vm10 = vcmask 416768   ;;  %vm565_vm11 = vcmask 408576  }
  0x3b   : > { %s1412_s25 = sld [smem:[#allocation3 + $0x23]]  ;;  %vm704_vm12 = vcmask 400384   ;;  %vm983_vm13 = vcmask 384000   ;;  %vm1122_vm14 = vcmask 375808   ;;  %vm1261_vm15 = vcmask 367616  }
  0x3c   : > { %v315_v41 = vstv %s1406_s18  ;;  %s1418_s28 = sld [smem:[#allocation3 + $0x8]]  ;;  %s1752_s18 = smov 48  }
  0x3d   : > { %v294_v42 = vstv %s1404_s20  ;;  %s1420_s4 = sld [smem:[#allocation3 + $0xf]] }
  0x3e   : > { %v221_v3 = vld.sshfl [vmem:[#allocation1] sm:$0xff pattern:$0x75316420]  ;;  %v222_v4 = vld.sshfl [vmem:[#allocation1 + $0x8] sm:$0xff pattern:$0x75316420]  ;;  %v336_v43 = vstv %s1408_s21 }
  0x3f   : > { %v226_v5 = vsel %vm225_vm1, %v221_v3, 0.0  ;;  %v233_v6 = vsel %vm225_vm1, %v222_v4, 0.0  ;;  %242 = vst [vmem:[#allocation1] ss:$2 sm:$0xff] %v218_v0  ;;  %v401_v50 = vstv %s1414_s22  ;;  %s1422_s5 = sld [smem:[#allocation3 + $0x16]] }
  0x40   : > { %v227_v7 = vrot.slane %v226_v5, 4  ;;  %v234_v8 = vrot.slane %v233_v6, 4  ;;  %v359_v51 = vstv %s1410_s24  ;;  %s1407_s11 = sld [smem:[#allocation3 + $0x3f]] }
  0x41   : > { %v380_v52 = vstv %s1412_s25  ;;  %s1405_s20 = sld [smem:[#allocation3 + $0x38]] }
  0x42   : > { %v228_v9 = vadd.f32 %v227_v7, %v226_v5  ;;  %v235_v10 = vadd.f32 %v234_v8, %v233_v6  ;;  %v440_v56 = vstv %s1418_s28  ;;  %s1409_s21 = sld [smem:[#allocation3 + $0x46]] }
  0x43   : > { %v460_v57 = vstv %s1420_s4  ;;  %s1411_s22 = sld [smem:[#allocation3 + $0x4d]] }
  0x44   : > { %v229_v11 = vrot.slane %v228_v9, 2  ;;  %v236_v12 = vrot.slane %v235_v10, 2  ;;  %s1413_s24 = sld [smem:[#allocation3 + $0x54]] }
  0x45   : > { %v480_v58 = vstv %s1422_s5  ;;  %s1415_s25 = sld [smem:[#allocation3 + $0x5b]] }
  0x46   : > { %v230_v13 = vadd.f32 %v229_v11, %v228_v9  ;;  %v237_v14 = vadd.f32 %v236_v12, %v235_v10  ;;  %v243_v15 = vld.sshfl [vmem:[#allocation1] sm:$0xff pattern:$0x75316420]  ;;  %v244_v16 = vld.sshfl [vmem:[#allocation1 + $0x8] sm:$0xff pattern:$0x75316420]  ;;  %v326_v63 = vstv %s1407_s11 }
  0x47   : > { %v247_v17 = vsel %vm225_vm1, %v243_v15, -inf  ;;  %v254_v18 = vsel %vm225_vm1, %v244_v16, -inf  ;;  %v305_v0 = vstv %s1405_s20  ;;  %s1421_s28 = sld [smem:[#allocation3 + $0x40]] }
  0x48   : > { %v231_v19 = vrot.slane %v230_v13, 1  ;;  %v238_v20 = vrot.slane %v237_v14, 1  ;;  %v248_v21 = vrot.slane %v247_v17, 4  ;;  %v255_v22 = vrot.slane %v254_v18, 4  ;;  %s1423_s4 = sld [smem:[#allocation3 + $0x47]] }
  0x49   : > { %v347_v1 = vstv %s1409_s21  ;;  %v370_v6 = vstv %s1411_s22  ;;  %s1419_s5 = sld [smem:[#allocation3 + $0x39]] }
  0x4a   : > { %v232_v23 = vadd.f32 %v231_v19, %v230_v13  ;;  %v239_v24 = vadd.f32 %v238_v20, %v237_v14  ;;  %v249_v25 = vmax.f32 %v247_v17, %v248_v21  ;;  %v256_v26 = vmax.f32 %v254_v18, %v255_v22  ;;  %s1424_s11 = sld [smem:[#allocation3 + $0x1d]] }
  0x4b   : > { %v391_v7 = vstv %s1413_s24  ;;  %v412_v8 = vstv %s1415_s25  ;;  %s1426_s20 = sld [smem:[#allocation3 + $0x24]] }
  0x4c   : > { %v240_v27 = vmul.f32 0.25, %v232_v23  ;;  %v241_v28 = vmul.f32 0.25, %v239_v24  ;;  %v250_v29 = vrot.slane %v249_v25, 2  ;;  %v257_v30 = vrot.slane %v256_v26, 2  ;;  %s1425_s21 = sld [smem:[#allocation3 + $0x4e]] }
  0x4d   : > { %v470_v12 = vstv %s1421_s28  ;;  %s1427_s22 = sld [smem:[#allocation3 + $0x55]] }
  0x4e   : > { %v269_v31 = vrot.slane %v241_v28, 7  ;;  %v251_v33 = vmax.f32 %v249_v25, %v250_v29  ;;  %v258_v34 = vmax.f32 %v256_v26, %v257_v30  ;;  %v490_v13 = vstv %s1423_s4  ;;  %s1429_s24 = sld [smem:[#allocation3 + $0x5c]] }
  0x4f   : > { %v450_v14 = vstv %s1419_s5  ;;  %s1428_s25 = sld [smem:[#allocation3 + $0x2b]] }
  0x50   : > { %v271_v35 = vsel %vm270_vm2, %v240_v27, %v269_v31  ;;  %v252_v36 = vrot.slane %v251_v33, 1  ;;  %v259_v37 = vrot.slane %v258_v34, 1  ;;  %v500_v18 = vstv %s1424_s11  ;;  %s1434_s28 = sld [smem:[#allocation3 + $0x10]] }
  0x51   : > { %275 = vst.msk [vmem:[#allocation2 + $0x1] sm:$0x3] %vm1900_vm3, %v271_v35  ;;  %v520_v19 = vstv %s1426_s20  ;;  %s1433_s4 = sld [smem:[#allocation3 + $0x3a]] }
  0x52   : > { %v253_v38 = vmax.f32 %v251_v33, %v252_v36  ;;  %v260_v39 = vmax.f32 %v258_v34, %v259_v37  ;;  %v510_v20 = vstv %s1425_s21  ;;  %s1432_s5 = sld [smem:[#allocation3 + $0x9]] }
  0x53   : > { %v530_v24 = vstv %s1427_s22  ;;  %s1437_s11 = sld [smem:[#allocation3 + $0x48]] }
  0x54   : > { %v278_v40 = vrot.slane %v260_v39, 7  ;;  %v550_v25 = vstv %s1429_s24  ;;  %s1436_s20 = sld [smem:[#allocation3 + $0x17]] }
  0x55   : > { %v540_v26 = vstv %s1428_s25  ;;  %s1435_s21 = sld [smem:[#allocation3 + $0x41]] }
  0x56   : > { %v279_v44 = vsel %vm270_vm2, %v253_v38, %v278_v40  ;;  %v599_v30 = vstv %s1434_s28  ;;  %s1440_s22 = sld [smem:[#allocation3 + $0x25]] }
  0x57   : > { %282 = vst.msk [vmem:[#allocation2 + $0x5] sm:$0x3] %vm1900_vm3, %v279_v44  ;;  %v589_v31 = vstv %s1433_s4  ;;  %s1439_s24 = sld [smem:[#allocation3 + $0x4f]] }
  0x58   : > { %v1908_v45 = vld [vmem:[#allocation2] sm:$0x7]  ;;  %v579_v32 = vstv %s1432_s5  ;;  %s1438_s25 = sld [smem:[#allocation3 + $0x1e]] }
  0x59   : > { %v316_v46 = vmul.f32 %v315_v41, %v1908_v45  ;;  %v295_v47 = vmul.f32 %v294_v42, %v1908_v45  ;;  %v337_v48 = vmul.f32 %v336_v43, %v1908_v45  ;;  %v1918_v49 = vld [vmem:[#allocation2 + $0x1] sm:$0x7]  ;;  %v441_v59 = vmul.f32 %v440_v56, %v1908_v45  ;;  %s1443_s28 = sld [smem:[#allocation3 + $0x5d]] }
  0x5a   : > { %v402_v53 = vmul.f32 %v401_v50, %v1918_v49  ;;  %v360_v54 = vmul.f32 %v359_v51, %v1918_v49  ;;  %v381_v55 = vmul.f32 %v380_v52, %v1918_v49  ;;  %v461_v60 = vmul.f32 %v460_v57, %v1908_v45  ;;  %s1442_s4 = sld [smem:[#allocation3 + $0x2c]] }
  0x5b   : > { %318 = vrot.lane.b32.xlu1 %v316_v46, %s1747_s26  ;;  %297 = vrot.lane.b32.xlu0 %v295_v47, %s1748_s27  ;;  %v481_v61 = vmul.f32 %v480_v58, %v1908_v45  ;;  %v501_v21 = vmul.f32 %v500_v18, %v1918_v49  ;;  %v521_v22 = vmul.f32 %v520_v19, %v1918_v49  ;;  %v629_v36 = vstv %s1437_s11  ;;  %s1441_s5 = sld [smem:[#allocation3 + $0x56]] }
  0x5c   : > { %339 = vrot.lane.b32.xlu2 %v337_v48, %s1749_s29  ;;  %v541_v29 = vmul.f32 %v540_v26, %v1918_v49  ;;  %v600_v33 = vmul.f32 %v599_v30, %v1908_v45  ;;  %v580_v35 = vmul.f32 %v579_v32, %v1908_v45  ;;  %v619_v37 = vstv %s1436_s20  ;;  %s1447_s11 = sld [smem:[#allocation3 + $0x3b]] }
  0x5d   : > { %v609_v38 = vstv %s1435_s21  ;;  %v620_v40 = vmul.f32 %v619_v37, %v1908_v45  ;;  %v659_v42 = vstv %s1440_s22  ;;  %v649_v43 = vstv %s1439_s24  ;;  %s1446_s20 = sld [smem:[#allocation3 + $0xa]] }
  0x5e   : > { %v1932_v62 = vld [vmem:[#allocation2 + $0x4] sm:$0x7]  ;;  %v639_v44 = vstv %s1438_s25  ;;  %v660_v46 = vmul.f32 %v659_v42, %v1918_v49  ;;  %s1448_s21 = sld [smem:[#allocation3 + $0x11]] }
  0x5f   : > { %v327_v2 = vmul.f32 %v326_v63, %v1932_v62  ;;  %v306_v3 = vmul.f32 %v305_v0, %v1932_v62  ;;  %v348_v4 = vmul.f32 %v347_v1, %v1932_v62  ;;  %v1940_v5 = vld [vmem:[#allocation2 + $0x5] sm:$0x7]  ;;  %v471_v15 = vmul.f32 %v470_v12, %v1932_v62  ;;  %s1450_s22 = sld [smem:[#allocation3 + $0x18]]  ;;  %v757_v0 = vld [vmem:[#allocation2 + $0x1] sm:$0x3] }
  0x60   : > { %v371_v9 = vmul.f32 %v370_v6, %v1940_v5  ;;  %v392_v10 = vmul.f32 %v391_v7, %v1940_v5  ;;  %v413_v11 = vmul.f32 %v412_v8, %v1940_v5  ;;  %v491_v16 = vmul.f32 %v490_v13, %v1932_v62  ;;  %s1449_s24 = sld [smem:[#allocation3 + $0x42]] }
  0x61   : > { %v451_v17 = vmul.f32 %v450_v14, %v1932_v62  ;;  %v511_v23 = vmul.f32 %v510_v20, %v1940_v5  ;;  %v531_v27 = vmul.f32 %v530_v24, %v1940_v5  ;;  %v551_v28 = vmul.f32 %v550_v25, %v1940_v5  ;;  %s1451_s25 = sld [smem:[#allocation3 + $0x49]] }
  0x62   : > { %v590_v34 = vmul.f32 %v589_v31, %v1932_v62  ;;  %v630_v39 = vmul.f32 %v629_v36, %v1932_v62  ;;  %v610_v41 = vmul.f32 %v609_v38, %v1932_v62  ;;  %v650_v47 = vmul.f32 %v649_v43, %v1940_v5 }
  0x63   : > { %404 = vrot.lane.b32.xlu1 %v402_v53, %s1750_s9  ;;  %362 = vrot.lane.b32.xlu0 %v360_v54, %s1751_s10  ;;  %v640_v48 = vmul.f32 %v639_v44, %v1918_v49  ;;  %v689_v50 = vstv %s1443_s28  ;;  %v679_v51 = vstv %s1442_s4  ;;  %s1460_s28 = sld [smem:[#allocation3 + $0xb]] }
  0x64   : > { %383 = vrot.lane.b32.xlu2 %v381_v55, %s1752_s18  ;;  %v669_v52 = vstv %s1441_s5  ;;  %v690_v53 = vmul.f32 %v689_v50, %v1940_v5  ;;  %v680_v54 = vmul.f32 %v679_v51, %v1918_v49  ;;  %v728_v56 = vstv %s1447_s11  ;;  %s1452_s4 = sld [smem:[#allocation3 + $0x1f]] }
  0x65   : > { %v670_v55 = vmul.f32 %v669_v52, %v1940_v5  ;;  %v718_v57 = vstv %s1446_s20  ;;  %v738_v58 = vstv %s1448_s21  ;;  %v760_v1 = vstv %s1450_s22  ;;  %s1461_s5 = sld [smem:[#allocation3 + $0x3c]] }
  0x66   : > { %v739_v63 = vmul.f32 %v738_v58, %v1908_v45  ;;  %v761_v7 = vmul.f32 %v760_v1, %v757_v0  ;;  %s1462_s11 = sld [smem:[#allocation3 + $0x12]] }
  0x67   : > { %s1474_s20 = sld [smem:[#allocation3 + $0xc]] }
  0x68   : > { %s1475_s21 = sld [smem:[#allocation3 + $0x3d]] }
  0x69   : > { %s1463_s22 = sld [smem:[#allocation3 + $0x43]] }
  0x6b   : > { %443 = vrot.lane.b32.xlu1 %v441_v59, %s1748_s27  ;;  %463 = vrot.lane.b32.xlu0 %v461_v60, %s1747_s26  ;;  %v729_v60 = vmul.f32 %v728_v56, %v1932_v62  ;;  %v868_v12 = vstv %s1461_s5  ;;  %s2025_s5 = sld [smem:[#allocation3 + $0x19]] }
  0x6c   : > { %483 = vrot.lane.b32.xlu2 %v481_v61, %s1749_s29  ;;  %v719_v61 = vmul.f32 %v718_v57, %v1908_v45 }
  0x6d   : > { %v997_v18 = vstv %s1474_s20  ;;  %s1477_s20 = sld [smem:[#allocation3 + $0x44]] }
  0x6e   : > { %v998_v24 = vmul.f32 %v997_v18, %v1908_v45 }
  0x6f   : > { %v888_v26 = vstv %s1463_s22  ;;  %s2039_s22 = sld [smem:[#allocation3 + $0x32]] }
  0x70   : > { %v889_v32 = vmul.f32 %v888_v26, %v1932_v62 }
  0x71   : > { %v898_v37 = vstv %s2025_s5  ;;  %s2072_s5 = sld [smem:[#allocation3 + $0x45]] }
  0x73   : > { %329 = vrot.lane.b32.xlu1 %v327_v2, %s1747_s26  ;;  %308 = vrot.lane.b32.xlu0 %v306_v3, %s1748_s27  ;;  %v748_v2 = vstv %s1449_s24  ;;  %v758_v3 = vld [vmem:[#allocation2 + $0x5] sm:$0x3]  ;;  %s1488_s24 = sld [smem:[#allocation3 + $0xd]] }
  0x74   : > { %350 = vrot.lane.b32.xlu2 %v348_v4, %s1749_s29  ;;  %v770_v4 = vstv %s1451_s25  ;;  %v749_v8 = vmul.f32 %v748_v2, %v1932_v62  ;;  %s1476_s25 = sld [smem:[#allocation3 + $0x13]] }
  0x7a   : > { %v1017_v30 = vstv %s1476_s25  ;;  %s2049_s25 = sld [smem:[#allocation3 + $0x14]] }
  0x7b   : > { %373 = vrot.lane.b32.xlu1 %v371_v9, %s1751_s10  ;;  %394 = vrot.lane.b32.xlu0 %v392_v10, %s1752_s18  ;;  %v771_v9 = vmul.f32 %v770_v4, %v758_v3  ;;  %v858_v10 = vstv %s1460_s28  ;;  %s2019_s28 = sld [smem:[#allocation3]] }
  0x7c   : > { %415 = vrot.lane.b32.xlu2 %v413_v11, %s1750_s9  ;;  %v780_v11 = vstv %s1452_s4  ;;  %v859_v14 = vmul.f32 %v858_v10, %v1908_v45  ;;  %s2021_s4 = sld [smem:[#allocation3 + $0x31]] }
  0x80   : > { %v1156_v56 = vstv %s2049_s25  ;;  %s2132_s25 = sld [smem:[#allocation3 + $0x4c]] }
  0x82   : > { %v290_v36 = vstv %s2021_s4  ;;  %s2065_s4 = sld [smem:[#allocation3 + $0x50]] }
  0x83   : > { %473 = vrot.lane.b32.xlu1 %v471_v15, %s1747_s26  ;;  %493 = vrot.lane.b32.xlu0 %v491_v16, %s1749_s29  ;;  %v781_v15 = vmul.f32 %v780_v11, %v1918_v49  ;;  %v869_v16 = vmul.f32 %v868_v12, %v1932_v62  ;;  %v291_v43 = vmul.f32 %v290_v36, %v1932_v62 }
  0x84   : > { %453 = vrot.lane.b32.xlu2 %v451_v17, %s1748_s27  ;;  %v878_v17 = vstv %s1462_s11  ;;  %s1489_s11 = sld [smem:[#allocation3 + $0x3e]] }
  0x8a   : > { %v1146_v38 = vstv %s1489_s11  ;;  %s2075_s11 = sld [smem:[#allocation3 + $0x20]] }
  0x8b   : > { %503 = vrot.lane.b32.xlu1 %v501_v21, %s1751_s10  ;;  %523 = vrot.lane.b32.xlu0 %v521_v22, %s1752_s18  ;;  %v1007_v21 = vstv %s1475_s21  ;;  %s2037_s21 = sld [smem:[#allocation3 + $0x1]] }
  0x8c   : > { %513 = vrot.lane.b32.xlu2 %v511_v23, %s1751_s10  ;;  %v879_v23 = vmul.f32 %v878_v17, %v1908_v45  ;;  %v1008_v25 = vmul.f32 %v1007_v21, %v1932_v62 }
  0x91   : > { %v432_v52 = vstv %s2037_s21  ;;  %s2105_s21 = sld [smem:[#allocation3 + $0x26]] }
  0x93   : > { %533 = vrot.lane.b32.xlu1 %v531_v27, %s1752_s18  ;;  %553 = vrot.lane.b32.xlu0 %v551_v28, %s1750_s9  ;;  %v1136_v27 = vstv %s1488_s24  ;;  %s2044_s24 = sld [smem:[#allocation3 + $0x4a]] }
  0x94   : > { %543 = vrot.lane.b32.xlu2 %v541_v29, %s1750_s9 }
  0x9b   : > { %602 = vrot.lane.b32.xlu1 %v600_v33, %s1747_s26  ;;  %592 = vrot.lane.b32.xlu0 %v590_v34, %s1748_s27  ;;  %v1137_v33 = vmul.f32 %v1136_v27, %v1908_v45  ;;  %v1018_v34 = vmul.f32 %v1017_v30, %v1908_v45  ;;  %v918_v30 = vstv %s2075_s11  ;;  %s2199_s11 = sld [smem:[#allocation3 + $0x22]] }
  0x9c   : > { %582 = vrot.lane.b32.xlu2 %v580_v35, %s1748_s27  ;;  %v286_v35 = vstv %s2019_s28  ;;  %s2053_s28 = sld [smem:[#allocation3 + $0x1a]] }
  0x9d   : > { %v287_v44 = vmul.f32 %v286_v35, %v1908_v45 }
  0x9f   : > { %v292_v51 = vadd.f32 %v291_v43, %v287_v44 }
  0xa3   : > { %632 = vrot.lane.b32.xlu1 %v630_v39, %s1749_s29  ;;  %622 = vrot.lane.b32.xlu0 %v620_v40, %s1749_s29 }
  0xa4   : > { %612 = vrot.lane.b32.xlu2 %v610_v41, %s1747_s26  ;;  %v1027_v41 = vstv %s1477_s20  ;;  %s2100_s20 = sld [smem:[#allocation3 + $0x4b]] }
  0xa5   : > { %v1028_v50 = vmul.f32 %v1027_v41, %v1932_v62 }
  0xab   : > { %662 = vrot.lane.b32.xlu1 %v660_v46, %s1752_s18  ;;  %652 = vrot.lane.b32.xlu0 %v650_v47, %s1751_s10  ;;  %v899_v46 = vmul.f32 %v898_v37, %v1918_v49  ;;  %v1147_v47 = vmul.f32 %v1146_v38, %v1932_v62 }
  0xac   : > { %642 = vrot.lane.b32.xlu2 %v640_v48, %s1751_s10 }
  0xb3   : > { %692 = vrot.lane.b32.xlu1 %v690_v53, %s1750_s9  ;;  %682 = vrot.lane.b32.xlu0 %v680_v54, %s1750_s9  ;;  %v436_v54 = vstv %s2039_s22  ;;  %s2122_s22 = sld [smem:[#allocation3 + $0x21]] }
  0xb4   : > { %672 = vrot.lane.b32.xlu2 %v670_v55, %s1752_s18  ;;  %v908_v55 = vstv %s2044_s24  ;;  %v437_v3 = vmul.f32 %v436_v54, %v1932_v62  ;;  %s2128_s24 = sld [smem:[#allocation3 + $0x51]] }
  0xb5   : > { %v909_v4 = vmul.f32 %v908_v55, %v1940_v5 }
  0xb6   : > { %v1990_v59 = vpop.permute.xlu2 %339 }
  0xbb   : > { %731 = vrot.lane.b32.xlu1 %v729_v60, %s1748_s27  ;;  %721 = vrot.lane.b32.xlu0 %v719_v61, %s1748_s27  ;;  %v1037_v60 = vstv %s2053_s28  ;;  %s2154_s28 = sld [smem:[#allocation3 + $0x33]] }
  0xbc   : > { %741 = vrot.lane.b32.xlu2 %v739_v63, %s1747_s26  ;;  %v433_v63 = vmul.f32 %v432_v52, %v1908_v45  ;;  %v1038_v11 = vmul.f32 %v1037_v60, %v1918_v49 }
  0xbe   : > { %v1998_v6 = vpop.permute.xlu2 %383  ;;  %v438_v17 = vadd.f32 %v437_v3, %v433_v63 }
  0xc3   : > { %763 = vrot.lane.b32.xlu1 %v761_v7, %s1749_s29  ;;  %751 = vrot.lane.b32.xlu0 %v749_v8, %s1747_s26  ;;  %v1157_v7 = vmul.f32 %v1156_v56, %v1908_v45 }
  0xc4   : > { %773 = vrot.lane.b32.xlu2 %v771_v9, %s1749_s29 }
  0xc6   : > { %v2004_v13 = vpop.permute.xlu2 %483 }
  0xc7   : > { %v485_v54 = vrot.slane %v2004_v13, 1 }
  0xcb   : > { %861 = vrot.lane.b32.xlu1 %v859_v14, %s1748_s27  ;;  %783 = vrot.lane.b32.xlu0 %v781_v15, %s1751_s10  ;;  %v341_v14 = vrot.slane %v1990_v59, 1 }
  0xcc   : > { %871 = vrot.lane.b32.xlu2 %v869_v16, %s1748_s27 }
  0xcd   : > { %v2012_v19 = vpop.permute.xlu1 %318  ;;  %v298_v20 = vpop.permute.xlu0 %297 }
  0xce   : > { %v2014_v22 = vpop.permute.xlu2 %350  ;;  %v299_v48 = vrot.slane %v298_v20, 1  ;;  %v320_v61 = vrot.slane %v2012_v19, 1 }
  0xcf   : > { %v352_v16 = vrot.slane %v2014_v22, 1 }
  0xd0   : > { %v301_v53 = vsel %vm300_vm4, %v298_v20, %v299_v48  ;;  %v322_v15 = vsel %vm321_vm5, %v2012_v19, %v320_v61  ;;  %v790_v20 = vstv %s2065_s4  ;;  %v385_v61 = vrot.slane %v1998_v6, 7  ;;  %s2180_s4 = sld [smem:[#allocation3 + $0x57]] }
  0xd1   : > { %v303_v2 = vadd.f32 %v301_v53, %v292_v51  ;;  %v791_v36 = vmul.f32 %v790_v20, %v1940_v5  ;;  %v353_v38 = vsel %vm342_vm6, %v2014_v22, %v352_v16  ;;  %v800_v53 = vstv %s2105_s21  ;;  %s2211_s21 = sld [smem:[#allocation3 + $0x28]] }
  0xd2   : > { %v1186_v16 = vstv %s2132_s25  ;;  %s2225_s25 = sld [smem:[#allocation3 + $0x3]] }
  0xd3   : > { %881 = vrot.lane.b32.xlu1 %v879_v23, %s1747_s26  ;;  %1000 = vrot.lane.b32.xlu0 %v998_v24, %s1748_s27 }
  0xd4   : > { %1010 = vrot.lane.b32.xlu2 %v1008_v25, %s1748_s27  ;;  %v1166_v25 = vstv %s2072_s5  ;;  %s1753_s5 = smov 51  }
  0xd5   : > { %v2028_v28 = vpop.permute.xlu1 %404  ;;  %v2030_v29 = vpop.permute.xlu0 %362  ;;  %v1167_v37 = vmul.f32 %v1166_v25, %v1932_v62 }
  0xd6   : > { %v2032_v31 = vpop.permute.xlu2 %415  ;;  %v406_v25 = vrot.slane %v2028_v28, 7 }
  0xdb   : > { %891 = vrot.lane.b32.xlu1 %v889_v32, %s1747_s26  ;;  %1139 = vrot.lane.b32.xlu0 %v1137_v33, %s1748_s27  ;;  %v343_v32 = vsel %vm342_vm6, %v1990_v59, %v341_v14  ;;  %v919_v59 = vmul.f32 %v918_v30, %v1918_v49  ;;  %v1187_v30 = vmul.f32 %v1186_v16, %v1940_v5 }
  0xdc   : > { %1020 = vrot.lane.b32.xlu2 %v1018_v34, %s1747_s26 }
  0xdd   : > { %v444_v39 = vpop.permute.xlu1 %443  ;;  %v2051_v40 = vpop.permute.xlu0 %463 }
  0xde   : > { %v2055_v42 = vpop.permute.xlu2 %453  ;;  %v445_v8 = vrot.slane %v444_v39, 1  ;;  %v465_v44 = vrot.slane %v2051_v40, 1 }
  0xdf   : > { %v455_v23 = vrot.slane %v2055_v42, 1 }
  0xe0   : > { %v446_v21 = vsel %vm300_vm4, %v444_v39, %v445_v8  ;;  %v364_v39 = vrot.slane %v2030_v29, 7  ;;  %v466_v55 = vsel %vm321_vm5, %v2051_v40, %v465_v44 }
  0xe1   : > { %v448_v34 = vadd.f32 %v446_v21, %v438_v17  ;;  %v456_v41 = vsel %vm300_vm4, %v2055_v42, %v455_v23  ;;  %v1047_v42 = vstv %s2100_s20  ;;  %s1456_s20 = sld [smem:[#allocation3 + $0x2d]] }
  0xe2   : > { %v366_v22 = vsel %vm365_vm7, %v364_v39, %v2030_v29  ;;  %v1048_v60 = vmul.f32 %v1047_v42, %v1940_v5 }
  0xe3   : > { %901 = vrot.lane.b32.xlu1 %v899_v46, %s1749_s29  ;;  %1149 = vrot.lane.b32.xlu0 %v1147_v47, %s1748_s27  ;;  %s2093_s27 = sld [smem:[#allocation3 + $0x1b]]  ;;  %v458_v46 = vadd.f32 %v456_v41, %v448_v34  ;;  %v575_v41 = vstv %s2154_s28 }
  0xe4   : > { %1030 = vrot.lane.b32.xlu2 %v1028_v50, %s1747_s26  ;;  %v576_v42 = vmul.f32 %v575_v41, %v1932_v62  ;;  %s1483_s28 = sld [smem:[#allocation3 + $0x59]] }
  0xe5   : > { %v330_v57 = vpop.permute.xlu1 %329  ;;  %v309_v58 = vpop.permute.xlu0 %308 }
  0xe6   : > { %v310_v0 = vrot.slane %v309_v58, 1  ;;  %v2079_v1 = vpop.permute.xlu2 %513  ;;  %v331_v9 = vrot.slane %v330_v57, 1 }
  0xe7   : > { %v515_v17 = vrot.slane %v2079_v1, 7 }
  0xe8   : > { %v311_v10 = vsel %vm300_vm4, %v309_v58, %v310_v0  ;;  %v332_v24 = vsel %vm321_vm5, %v330_v57, %v331_v9  ;;  %v468_v57 = vadd.f32 %v466_v55, %v458_v46  ;;  %v387_v9 = vsel %vm386_vm8, %v385_v61, %v1998_v6 }
  0xe9   : > { %v313_v12 = vadd.f32 %v311_v10, %v303_v2  ;;  %v1176_v48 = vstv %s2093_s27  ;;  %v801_v2 = vmul.f32 %v800_v53, %v1918_v49  ;;  %v810_v61 = vstv %s2180_s4  ;;  %s1754_s27 = smov 50   ;;  %s2239_s4 = sld [smem:[#allocation3 + $0x5f]] }
  0xea   : > { %v1177_v58 = vmul.f32 %v1176_v48, %v1918_v49 }
  0xeb   : > { %v324_v18 = vadd.f32 %v322_v15, %v313_v12  ;;  %911 = vrot.lane.b32.xlu1 %v909_v4, %s1749_s29  ;;  %1159 = vrot.lane.b32.xlu0 %v1157_v7, %s1747_s26  ;;  %v486_v4 = vsel %vm342_vm6, %v2004_v13, %v485_v54  ;;  %v928_v12 = vstv %s2128_s24  ;;  %s2223_s24 = sld [smem:[#allocation3 + $0x2e]] }
  0xec   : > { %1040 = vrot.lane.b32.xlu2 %v1038_v11, %s1749_s29  ;;  %v1057_v11 = vstv %s2122_s22  ;;  %s1495_s22 = sld [smem:[#allocation3 + $0x53]] }
  0xed   : > { %v334_v19 = vadd.f32 %v332_v24, %v324_v18  ;;  %v374_v26 = vpop.permute.xlu1 %373  ;;  %v2102_v27 = vpop.permute.xlu0 %394  ;;  %v1058_v23 = vmul.f32 %v1057_v11, %v1918_v49  ;;  %v929_v24 = vmul.f32 %v928_v12, %v1940_v5 }
  0xee   : > { %v2109_v33 = vpop.permute.xlu2 %543  ;;  %v375_v47 = vrot.slane %v374_v26, 7  ;;  %v396_v10 = vrot.slane %v2102_v27, 7 }
  0xef   : > { %v345_v35 = vadd.f32 %v343_v32, %v334_v19  ;;  %v545_v44 = vrot.slane %v2109_v33, 7 }
  0xf0   : > { %v376_v63 = vsel %vm365_vm7, %v375_v47, %v374_v26  ;;  %v397_v19 = vsel %vm386_vm8, %v396_v10, %v2102_v27  ;;  %v417_v27 = vrot.slane %v2032_v31, 7 }
  0xf1   : > { %v355_v43 = vadd.f32 %v353_v38, %v345_v35  ;;  %v516_v35 = vsel %vm365_vm7, %v515_v17, %v2079_v1  ;;  %v408_v38 = vsel %vm407_vm9, %v406_v25, %v2028_v28 }
  0xf3   : > { %793 = vrot.lane.b32.xlu1 %v791_v36, %s1751_s10  ;;  %1169 = vrot.lane.b32.xlu0 %v1167_v37, %s1747_s26  ;;  %v368_v50 = vadd.f32 %v366_v22, %v355_v43  ;;  %s2149_s26 = sld [smem:[#allocation3 + $0x2]] }
  0xf4   : > { %921 = vrot.lane.b32.xlu2 %v919_v59, %s1751_s10 }
  0xf5   : > { %v474_v51 = vpop.permute.xlu1 %473  ;;  %v494_v52 = vpop.permute.xlu0 %493  ;;  %v378_v40 = vadd.f32 %v376_v63, %v368_v50  ;;  %v418_v50 = vsel %vm407_vm9, %v417_v27, %v2032_v31 }
  0xf6   : > { %v475_v56 = vrot.slane %v474_v51, 1  ;;  %v2137_v29 = vpop.permute.xlu2 %582  ;;  %v495_v7 = vrot.slane %v494_v52, 1 }
  0xf7   : > { %v389_v13 = vadd.f32 %v387_v9, %v378_v40 }
  0xf8   : > { %v476_v0 = vsel %vm321_vm5, %v474_v51, %v475_v56  ;;  %v496_v18 = vsel %vm342_vm6, %v494_v52, %v495_v7  ;;  %v584_v51 = vrot.slane %v2137_v29, 1  ;;  %v546_v56 = vsel %vm407_vm9, %v545_v44, %v2109_v33 }
  0xf9   : > { %v478_v3 = vadd.f32 %v476_v0, %v468_v57  ;;  %v399_v32 = vadd.f32 %v397_v19, %v389_v13  ;;  %v571_v39 = vstv %s2149_s26  ;;  %v811_v7 = vmul.f32 %v810_v61, %v1940_v5  ;;  %s2229_s26 = sld [smem:[#allocation3 + $0x34]] }
  0xfa   : > { %v572_v28 = vmul.f32 %v571_v39, %v1908_v45 }
  0xfb   : > { %v488_v8 = vadd.f32 %v486_v4, %v478_v3  ;;  %1179 = vrot.lane.b32.xlu1 %v1177_v58, %s1749_s29  ;;  %1050 = vrot.lane.b32.xlu0 %v1048_v60, %s1749_s29  ;;  %v410_v59 = vadd.f32 %v408_v38, %v399_v32  ;;  %v585_v60 = vsel %vm300_vm4, %v2137_v29, %v584_v51 }
  0xfc   : > { %803 = vrot.lane.b32.xlu2 %v801_v2, %s1752_s18  ;;  %v577_v57 = vadd.f32 %v576_v42, %v572_v28 }
  0xfd   : > { %v504_v14 = vpop.permute.xlu1 %503  ;;  %v524_v15 = vpop.permute.xlu0 %523  ;;  %v498_v6 = vadd.f32 %v496_v18, %v488_v8  ;;  %v420_v55 = vadd.f32 %v418_v50, %v410_v59  ;;  %v958_v50 = vstv %s2223_s24  ;;  %s2273_s24 = sld [smem:[#allocation3 + $0x30]] }
  0xfe   : > { %v505_v20 = vrot.slane %v504_v14, 7  ;;  %v2162_v21 = vpop.permute.xlu2 %612  ;;  %v525_v36 = vrot.slane %v524_v15, 7  ;;  %v587_v4 = vadd.f32 %v585_v60, %v577_v57 }
  0xff   : > { %v614_v29 = vrot.slane %v2162_v21, 1 }
 0x100   : > { %v506_v26 = vsel %vm365_vm7, %v505_v20, %v504_v14  ;;  %v526_v46 = vsel %vm386_vm8, %v525_v36, %v524_v15  ;;  %v1196_v15 = vstv %s2199_s11  ;;  %v1077_v36 = vstv %s2211_s21  ;;  %s2257_s11 = sld [smem:[#allocation3 + $0x60]] }
 0x101   : > { %v508_v34 = vadd.f32 %v506_v26, %v498_v6  ;;  %v615_v14 = vsel %vm321_vm5, %v2162_v21, %v614_v29  ;;  %v820_v26 = vstv %s1456_s20  ;;  %s1755_s20 = smov 49   ;;  %s2262_s21 = sld [smem:[#allocation3 + $0x4]] }
 0x103   : > { %v518_v37 = vadd.f32 %v516_v35, %v508_v34  ;;  %1060 = vrot.lane.b32.xlu1 %v1058_v23, %s1751_s10  ;;  %931 = vrot.lane.b32.xlu0 %v929_v24, %s1751_s10  ;;  %v1197_v24 = vmul.f32 %v1196_v15, %v1918_v49  ;;  %v821_v34 = vmul.f32 %v820_v26, %v1918_v49 }
 0x104   : > { %1189 = vrot.lane.b32.xlu2 %v1187_v30, %s1749_s29  ;;  %s2191_s29 = sld [smem:[#allocation3 + $0x27]] }
 0x105   : > { %v534_v43 = vpop.permute.xlu1 %533  ;;  %v554_v1 = vpop.permute.xlu0 %553  ;;  %v528_v48 = vadd.f32 %v526_v46, %v518_v37  ;;  %v1206_v46 = vstv %s1495_s22  ;;  %s2266_s22 = sld [smem:[#allocation3 + $0x35]] }
 0x106   : > { %v535_v22 = vrot.slane %v534_v43, 7  ;;  %v643_v47 = vpop.permute.xlu2 %642  ;;  %v555_v53 = vrot.slane %v554_v1, 7  ;;  %v1207_v28 = vmul.f32 %v1206_v46, %v1940_v5 }
 0x107   : > { %v644_v25 = vrot.slane %v643_v47, 7 }
 0x108   : > { %v536_v52 = vsel %vm386_vm8, %v535_v22, %v534_v43  ;;  %v556_v31 = vsel %vm407_vm9, %v555_v53, %v554_v1  ;;  %v1078_v43 = vmul.f32 %v1077_v36, %v1918_v49 }
 0x109   : > { %v538_v54 = vadd.f32 %v536_v52, %v528_v48  ;;  %v645_v35 = vsel %vm365_vm7, %v644_v25, %v643_v47  ;;  %v1107_v25 = vstv %s2257_s11  ;;  %s1499_s11 = sld [smem:[#allocation3 + $0x61]] }
 0x10a   : > { %v938_v9 = vstv %s2191_s29  ;;  %s2243_s29 = sld [smem:[#allocation3 + $0x52]] }
 0x10b   : > { %v548_v58 = vadd.f32 %v546_v56, %v538_v54  ;;  %423 = vrot.lane.b32.xlu0 %v420_v55, %s1753_s5  ;;  %v939_v13 = vmul.f32 %v938_v9, %v1918_v49  ;;  %v710_v55 = vstv %s2225_s25  ;;  %v714_v56 = vstv %s2229_s26  ;;  %s2250_s5 = sld [smem:[#allocation3 + $0x2f]] }
 0x10c   : > { %s2283_s25 = sld [smem:[#allocation3 + $0x5e]]  ;;  %v854_v36 = vstv %s2266_s22 }
 0x10d   : > { %v558_v63 = vadd.f32 %v556_v31, %v548_v58  ;;  %v603_v0 = vpop.permute.xlu1 %602  ;;  %v593_v2 = vpop.permute.xlu0 %592  ;;  %v959_v58 = vmul.f32 %v958_v50, %v1918_v49  ;;  %v1087_v31 = vstv %s1483_s28  ;;  %s2288_s26 = sld [smem:[#allocation3 + $0x5]] }
 0x10e   : > { %v604_v40 = vrot.slane %v603_v0, 1  ;;  %v594_v3 = vrot.slane %v593_v2, 1  ;;  %v673_v33 = vpop.permute.xlu2 %672  ;;  %s2292_s28 = sld [smem:[#allocation3 + $0x36]] }
 0x10f   : > { %562 = vrot.lane.b32.xlu1 %v558_v63, %s1754_s27  ;;  %v674_v1 = vrot.slane %v673_v33, 7  ;;  %s2260_s27 = sld [smem:[#allocation3 + $0x58]] }
 0x110   : > { %v595_v8 = vsel %vm300_vm4, %v593_v2, %v594_v3  ;;  %v605_v11 = vsel %vm321_vm5, %v603_v0, %v604_v40  ;;  %v711_v0 = vmul.f32 %v710_v55, %v1908_v45  ;;  %v715_v2 = vmul.f32 %v714_v56, %v1932_v62 }
 0x111   : > { %v597_v10 = vadd.f32 %v595_v8, %v587_v4  ;;  %v675_v42 = vsel %vm386_vm8, %v674_v1, %v673_v33  ;;  %v1088_v33 = vmul.f32 %v1087_v31, %v1940_v5  ;;  %v968_v4 = vstv %s2239_s4  ;;  %s1486_s4 = sld [smem:[#allocation3 + $0x6]] }
 0x112   : > { %v716_v45 = vadd.f32 %v715_v2, %v711_v0  ;;  %v1097_v15 = vstv %s2250_s5  ;;  %v855_v1 = vmul.f32 %v854_v36, %v1932_v62  ;;  %s1497_s5 = sld [smem:[#allocation3 + $0x5a]] }
 0x113   : > { %v607_v12 = vadd.f32 %v605_v11, %v597_v10  ;;  %813 = vrot.lane.b32.xlu0 %v811_v7, %s1752_s18  ;;  %v1067_v11 = vstv %s2243_s29  ;;  %v989_v56 = vstv %s2288_s26  ;;  %s1487_s29 = sld [smem:[#allocation3 + $0x37]] }
 0x115   : > { %v633_v16 = vpop.permute.xlu1 %632  ;;  %v623_v17 = vpop.permute.xlu0 %622  ;;  %v617_v23 = vadd.f32 %v615_v14, %v607_v12  ;;  %v969_v12 = vmul.f32 %v968_v4, %v1940_v5 }
 0x116   : > { %v634_v18 = vrot.slane %v633_v16, 1  ;;  %v624_v20 = vrot.slane %v623_v17, 1  ;;  %v2213_v6 = vpop.permute.xlu2 %741 }
 0x117   : > { %941 = vrot.lane.b32.xlu1 %v939_v13, %s1752_s18  ;;  %v743_v8 = vrot.slane %v2213_v6, 1 }
 0x118   : > { %v625_v19 = vsel %vm342_vm6, %v623_v17, %v624_v20  ;;  %v635_v30 = vsel %vm342_vm6, %v633_v16, %v634_v18  ;;  %v1068_v17 = vmul.f32 %v1067_v11, %v1940_v5 }
 0x119   : > { %v627_v21 = vadd.f32 %v625_v19, %v617_v23  ;;  %v744_v18 = vsel %vm321_vm5, %v2213_v6, %v743_v8 }
 0x11b   : > { %v637_v32 = vadd.f32 %v635_v30, %v627_v21  ;;  %1199 = vrot.lane.b32.xlu0 %v1197_v24, %s1751_s10  ;;  %v1098_v24 = vmul.f32 %v1097_v15, %v1918_v49  ;;  %v850_v30 = vstv %s2262_s21  ;;  %v1108_v49 = vmul.f32 %v1107_v25, %v1940_v5 }
 0x11d   : > { %v663_v37 = vpop.permute.xlu1 %662  ;;  %v653_v38 = vpop.permute.xlu0 %652  ;;  %v647_v59 = vadd.f32 %v645_v35, %v637_v32  ;;  %v948_v32 = vstv %s2260_s27  ;;  %s1758_s27 = smov 45  }
 0x11e   : > { %v664_v27 = vrot.slane %v663_v37, 7  ;;  %v654_v39 = vrot.slane %v653_v38, 7  ;;  %v2227_v41 = vpop.permute.xlu2 %773 }
 0x11f   : > { %823 = vrot.lane.b32.xlu1 %v821_v34, %s1750_s9  ;;  %v775_v6 = vrot.slane %v2227_v41, 7 }
 0x120   : > { %v655_v44 = vsel %vm365_vm7, %v654_v39, %v653_v38  ;;  %v665_v47 = vsel %vm386_vm8, %v664_v27, %v663_v37  ;;  %v1236_v27 = vstv %s2273_s24 }
 0x121   : > { %v657_v22 = vadd.f32 %v655_v44, %v647_v59  ;;  %v1589_v59 = vld [vmem:[#allocation2] sm:$0x7]  ;;  %v949_v44 = vmul.f32 %v948_v32, %v1940_v5  ;;  %v776_v46 = vsel %vm342_vm6, %v775_v6, %v2227_v41  ;;  %v993_v41 = vstv %s2292_s28 }
 0x122   : > { %v990_v2 = vmul.f32 %v1589_v59, %v989_v56 }
 0x123   : > { %v667_v48 = vadd.f32 %v665_v47, %v657_v22  ;;  %1080 = vrot.lane.b32.xlu0 %v1078_v43, %s1752_s18  ;;  %v851_v43 = vmul.f32 %v1589_v59, %v850_v30  ;;  %v1590_v47 = vld [vmem:[#allocation2 + $0x1] sm:$0x7] }
 0x125   : > { %v693_v51 = vpop.permute.xlu1 %692  ;;  %v683_v52 = vpop.permute.xlu0 %682  ;;  %v677_v57 = vadd.f32 %v675_v42, %v667_v48  ;;  %v1237_v48 = vmul.f32 %v1590_v47, %v1236_v27  ;;  %v856_v50 = vadd.f32 %v855_v1, %v851_v43  ;;  %v1592_v27 = vld [vmem:[#allocation2 + $0x5] sm:$0x7] }
 0x126   : > { %v694_v53 = vrot.slane %v693_v51, 7  ;;  %v684_v54 = vrot.slane %v683_v52, 7  ;;  %v2248_v61 = vpop.permute.xlu2 %871 }
 0x127   : > { %1209 = vrot.lane.b32.xlu1 %v1207_v28, %s1751_s10  ;;  %v873_v28 = vrot.slane %v2248_v61, 1 }
 0x128   : > { %v685_v60 = vsel %vm407_vm9, %v684_v54, %v683_v52  ;;  %v695_v40 = vsel %vm407_vm9, %v694_v53, %v693_v51  ;;  %v830_v53 = vstv %s2283_s25  ;;  %s217_s25 = scalar_lea.vmem [#allocation10], %s1401_s23  ;;  %s1688_s23 = scalar_lea.hbm %s2448_s3, 16 }
 0x129   : > { %v687_v63 = vadd.f32 %v685_v60, %v677_v57  ;;  %v874_v57 = vsel %vm300_vm4, %v2248_v61, %v873_v28  ;;  %v831_v31 = vmul.f32 %v830_v53, %v1940_v5  ;;  %s1293_s26 = sshll.u32 %s217_s25, 4  ;;  %s1294_s26 = int_to_ptr.vmem [resolvable:$true] %s1293_s26 }
 0x12b   : > { %961 = vrot.lane.b32.xlu0 %v959_v58, %s1750_s9  ;;  %v697_v3 = vadd.f32 %v695_v40, %v687_v63  ;;  %v1591_v40 = vld [vmem:[#allocation2 + $0x4] sm:$0x7] }
 0x12d   : > { %v732_v7 = vpop.permute.xlu1 %731  ;;  %701 = vrot.lane.b32.xlu2 %v697_v3, %s1755_s20  ;;  %v722_v29 = vpop.permute.xlu0 %721  ;;  %v994_v3 = vmul.f32 %v1591_v40, %v993_v41  ;;  %s1506_s20 = sshll.u32 %s1800_s16, 3  ;;  %s1280_s16 = scalar_lea.sflag [#allocation5], %s1883_s8 }
 0x12e   : > { %v733_v9 = vrot.slane %v732_v7, 1  ;;  %v723_v10 = vrot.slane %v722_v29, 1  ;;  %v2278_v20 = vpop.permute.xlu2 %1010  ;;  %s1291_s24 = scalar_lea.hbm %s2448_s3, %s1506_s20 }
 0x12f   : > { %1090 = vrot.lane.b32.xlu1 %v1088_v33, %s1752_s18  ;;  %v1012_v4 = vrot.slane %v2278_v20, 1  ;;  %v995_v61 = vadd.f32 %v994_v3, %v990_v2  ;;  %s1295_s28 = sshll.u32 %s1291_s24, 4  ;;  %s1296_s28 = int_to_ptr.hbm [resolvable:$true] %s1295_s28 }
 0x130   : > { %v734_v13 = vsel %vm300_vm4, %v732_v7, %v733_v9  ;;  %v724_v14 = vsel %vm300_vm4, %v722_v29, %v723_v10 }
 0x131   : > { %v726_v16 = vadd.f32 %v724_v14, %v716_v45  ;;  %v1013_v11 = vsel %vm300_vm4, %v2278_v20, %v1012_v4 }
 0x133   : > { %v736_v23 = vadd.f32 %v734_v13, %v726_v16  ;;  %971 = vrot.lane.b32.xlu0 %v969_v12, %s1750_s9 }
 0x135   : > { %v764_v19 = vpop.permute.xlu1 %763  ;;  %1070 = vrot.lane.b32.xlu2 %v1068_v17, %s1751_s10  ;;  %v746_v26 = vadd.f32 %v744_v18, %v736_v23  ;;  %v752_v21 = vpop.permute.xlu0 %751  ;;  %s2309_s10 = sld [smem:[#allocation3 + $0x29]]  ;;  %v1128_v23 = vstv %s1486_s4 }
 0x136   : > { %v765_v34 = vrot.slane %v764_v19, 7  ;;  %v753_v35 = vrot.slane %v752_v21, 1  ;;  %v1021_v42 = vpop.permute.xlu2 %1020  ;;  %v1129_v20 = vmul.f32 %v1589_v59, %v1128_v23 }
 0x137   : > { %1100 = vrot.lane.b32.xlu1 %v1098_v24, %s1750_s9  ;;  %v1022_v29 = vrot.slane %v1021_v42, 1  ;;  %v1132_v24 = vstv %s1487_s29 }
 0x138   : > { %v766_v37 = vsel %vm342_vm6, %v765_v34, %v764_v19  ;;  %v754_v38 = vsel %vm321_vm5, %v752_v21, %v753_v35  ;;  %v1133_v30 = vmul.f32 %v1591_v40, %v1132_v24  ;;  %v1226_v35 = vstv %s1497_s5 }
 0x139   : > { %v756_v39 = vadd.f32 %v754_v38, %v746_v26  ;;  %v1023_v18 = vsel %vm321_vm5, %v1021_v42, %v1022_v29  ;;  %v560_v29 = vld [vmem:[#allocation7 + $0x1] ss:$8 sm:$0x3] }
 0x13a   : > { %v1134_v38 = vadd.f32 %v1133_v30, %v1129_v20 }
 0x13b   : > { %v768_v22 = vadd.f32 %v766_v37, %v756_v39  ;;  %1110 = vrot.lane.b32.xlu0 %v1108_v49, %s1750_s9  ;;  %v1216_v9 = vstv %s2309_s10  ;;  %v1227_v39 = vmul.f32 %v1592_v27, %v1226_v35  ;;  %s1682_s10 = sshra.s32 %s1296_s28, 4  ;;  %s1683_s10 = int_to_ptr.hbm [resolvable:$true] %s1682_s10 }
 0x13c   : > { %v1217_v17 = vmul.f32 %v1590_v47, %v1216_v9  ;;  %s1684_s4 = scalar_lea.hbm %s1683_s10, 8  ;;  %p1689_p9 = scmp.lt.s32.totalorder %s1683_s10, %s2448_s3 }
 0x13d   : > { %v862_v51 = vpop.permute.xlu1 %861  ;;  %951 = vrot.lane.b32.xlu2 %v949_v44, %s1752_s18  ;;  %v778_v62 = vadd.f32 %v776_v46, %v768_v22  ;;  %v784_v52 = vpop.permute.xlu0 %783  ;;  %v1246_v22 = vstv %s1499_s11  ;;  %p1685_p1 = scmp.ne.s32.totalorder %s1683_s10, %s1684_s4  ;;  %p1690_p2 = scmp.lt.s32.totalorder %s1688_s23, %s1684_s4 }
 0x13e   : > { %v863_v54 = vrot.slane %v862_v51, 1  ;;  %v785_v55 = vrot.slane %v784_v52, 7  ;;  %v1031_v10 = vpop.permute.xlu2 %1030  ;;  %v1247_v28 = vmul.f32 %v1592_v27, %v1246_v22 }
 0x13f   : > { %1239 = vrot.lane.b32.xlu1 %v1237_v48, %s1750_s9  ;;  %v1032_v14 = vrot.slane %v1031_v10, 1  ;;  %p1686_p4 = pnand %p1685_p1, %p1845_p3  ;;  %p1691_p10 = por %p1690_p2, %p1689_p9 }
 0x140   : > { %v864_v58 = vsel %vm300_vm4, %v862_v51, %v863_v54  ;;  %v786_v60 = vsel %vm365_vm7, %v785_v55, %v784_v52 }
 0x141   : > { %v866_v63 = vadd.f32 %v864_v58, %v856_v50  ;;  %v2317_v0 = vadd.f32 %v786_v60, %v778_v62  ;;  %v1033_v19 = vsel %vm321_vm5, %v1031_v10, %v1032_v14  ;;  %v699_v14 = vld [vmem:[#allocation7 + $0x2] ss:$8 sm:$0x3]  ;;  %p1687_p8 = pneg %p1686_p4 }
 0x143   : > { %v876_v33 = vadd.f32 %v874_v57, %v866_v63  ;;  %p1692_p11 = pnand %p1691_p10, %p1687_p8 }
 0x145   : > { %v882_v7 = vpop.permute.xlu1 %881  ;;  %833 = vrot.lane.b32.xlu2 %v831_v31, %s1750_s9  ;;  %v1001_v45 = vpop.permute.xlu0 %1000 }
 0x146   : > { %v883_v8 = vrot.slane %v882_v7, 1  ;;  %v1002_v5 = vrot.slane %v1001_v45, 1  ;;  %v2339_v53 = vpop.permute.xlu2 %1040 }
 0x148   : > { %v884_v12 = vsel %vm321_vm5, %v882_v7, %v883_v8  ;;  %v1003_v13 = vsel %vm300_vm4, %v1001_v45, %v1002_v5  ;;  %v421_v7 = vld [vmem:[#allocation7] ss:$8 sm:$0x3] }
 0x149   : > { %v886_v15 = vadd.f32 %v884_v12, %v876_v33  ;;  %v1005_v16 = vadd.f32 %v1003_v13, %v995_v61 }
 0x14b   : > { %v1015_v25 = vadd.f32 %v1013_v11, %v1005_v16 }
 0x14d   : > { %v1025_v26 = vadd.f32 %v1023_v18, %v1015_v25  ;;  %v892_v21 = vpop.permute.xlu1 %891  ;;  %1219 = vrot.lane.b32.xlu2 %v1217_v17, %s1752_s18  ;;  %v1140_v32 = vpop.permute.xlu0 %1139 }
 0x14e   : > { %v893_v6 = vrot.slane %v892_v21, 1  ;;  %v1141_v34 = vrot.slane %v1140_v32, 1  ;;  %v922_v58 = vpop.permute.xlu2 %921 }
 0x14f   : > { %v2329_v36 = vadd.f32 %v1033_v19, %v1025_v26 }
 0x150   : > { %v894_v49 = vsel %vm321_vm5, %v892_v21, %v893_v6  ;;  %v1142_v43 = vsel %vm300_vm4, %v1140_v32, %v1141_v34 }
 0x151   : > { %v2332_v37 = vadd.f32 %v894_v49, %v886_v15  ;;  %v1144_v1 = vadd.f32 %v1142_v43, %v1134_v38  ;;  %v923_v38 = vrot.slane %v922_v58, 7 }
 0x155   : > { %v902_v44 = vpop.permute.xlu1 %901  ;;  %1229 = vrot.lane.b32.xlu2 %v1227_v39, %s1752_s18  ;;  %v1150_v59 = vpop.permute.xlu0 %1149 }
 0x156   : > { %v1151_v46 = vrot.slane %v1150_v59, 1  ;;  %v804_v63 = vpop.permute.xlu2 %803  ;;  %v903_v26 = vrot.slane %v902_v44, 7 }
 0x157   : > { %v805_v34 = vrot.slane %v804_v63, 7 }
 0x158   : > { %v1152_v47 = vsel %vm300_vm4, %v1150_v59, %v1151_v46  ;;  %v904_v32 = vsel %vm342_vm6, %v903_v26, %v902_v44  ;;  %v1042_v44 = vrot.slane %v2339_v53, 7 }
 0x159   : > { %v1154_v48 = vadd.f32 %v1152_v47, %v1144_v1  ;;  %v906_v39 = vadd.f32 %v904_v32, %v2332_v37  ;;  %v806_v59 = vsel %vm386_vm8, %v805_v34, %v804_v63 }
 0x15d   : > { %v912_v42 = vpop.permute.xlu1 %911  ;;  %1249 = vrot.lane.b32.xlu2 %v1247_v28, %s1750_s9  ;;  %v1160_v50 = vpop.permute.xlu0 %1159  ;;  %s1756_s9 = smov 47  }
 0x15e   : > { %v1161_v51 = vrot.slane %v1160_v50, 1  ;;  %v2350_v4 = vpop.permute.xlu2 %1189  ;;  %v913_v20 = vrot.slane %v912_v42, 7 }
 0x160   : > { %v1162_v62 = vsel %vm321_vm5, %v1160_v50, %v1161_v51  ;;  %v914_v49 = vsel %vm342_vm6, %v913_v20, %v912_v42 }
 0x161   : > { %v1164_v52 = vadd.f32 %v1162_v62, %v1154_v48  ;;  %v916_v47 = vadd.f32 %v914_v49, %v906_v39  ;;  %v924_v48 = vsel %vm365_vm7, %v923_v38, %v922_v58 }
 0x165   : > { %v794_v54 = vpop.permute.xlu1 %793  ;;  %v1170_v55 = vpop.permute.xlu0 %1169 }
 0x166   : > { %v1171_v56 = vrot.slane %v1170_v55, 1  ;;  %v795_v21 = vrot.slane %v794_v54, 7 }
 0x168   : > { %v1172_v41 = vsel %vm321_vm5, %v1170_v55, %v1171_v56  ;;  %v796_v6 = vsel %vm365_vm7, %v795_v21, %v794_v54  ;;  %v1043_v54 = vsel %vm342_vm6, %v1042_v44, %v2339_v53  ;;  %v926_v55 = vadd.f32 %v924_v48, %v916_v47 }
 0x169   : > { %v2342_v57 = vadd.f32 %v1172_v41, %v1164_v52  ;;  %v798_v43 = vadd.f32 %v796_v6, %v2317_v0 }
 0x16b   : > { %v808_v50 = vadd.f32 %v806_v59, %v798_v43 }
 0x16d   : > { %v2344_v60 = vpop.permute.xlu0 %1050  ;;  %v2346_v31 = vpop.permute.xlu1 %1179 }
 0x16e   : > { %v1052_v37 = vrot.slane %v2344_v60, 7 }
 0x175   : > { %v932_v2 = vpop.permute.xlu0 %931  ;;  %v2348_v40 = vpop.permute.xlu1 %1060 }
 0x176   : > { %v933_v46 = vrot.slane %v932_v2, 7  ;;  %v1062_v58 = vrot.slane %v2348_v40, 7 }
 0x178   : > { %v934_v0 = vsel %vm365_vm7, %v933_v46, %v932_v2 }
 0x17d   : > { %v424_v3 = vpop.permute.xlu0 %423 }
 0x17e   : > { %v425_v33 = vrot.slane %v424_v3, 1 }
 0x180   : > { %v427_v45 = vsel %vm426_vm10, %v424_v3, %v425_v33 }
 0x181   : > { %v563_v61 = vpop.permute.xlu1 %562  ;;  %v429_v9 = vmul.f32 %v427_v45, %v421_v7  ;;  %v1181_v7 = vrot.slane %v2346_v31, 7 }
 0x182   : > { %v564_v8 = vrot.slane %v563_v61, 1 }
 0x184   : > { %v566_v5 = vsel %vm565_vm11, %v563_v61, %v564_v8  ;;  %v936_v61 = vadd.f32 %v934_v0, %v926_v55 }
 0x185   : > { %v568_v10 = vmul.f32 %v566_v5, %v560_v29  ;;  %v814_v11 = vpop.permute.xlu0 %813  ;;  %v1053_v29 = vsel %vm342_vm6, %v1052_v37, %v2344_v60 }
 0x186   : > { %v815_v27 = vrot.slane %v814_v11, 7 }
 0x187   : > { %v569_v12 = vadd.f32 %v568_v10, %v429_v9  ;;  %v702_v13 = vpop.permute.xlu2 %701  ;;  %v1045_v9 = vadd.f32 %v1043_v54, %v2329_v36 }
 0x188   : > { %v703_v15 = vrot.slane %v702_v13, 1  ;;  %v816_v28 = vsel %vm386_vm8, %v815_v27, %v814_v11 }
 0x189   : > { %v942_v16 = vpop.permute.xlu1 %941  ;;  %v818_v56 = vadd.f32 %v816_v28, %v808_v50 }
 0x18a   : > { %v705_v17 = vsel %vm704_vm12, %v702_v13, %v703_v15  ;;  %v943_v42 = vrot.slane %v942_v16, 7  ;;  %v1055_v15 = vadd.f32 %v1053_v29, %v1045_v9  ;;  %v978_v9 = vld [vmem:[#allocation7 + $0x4] ss:$8 sm:$0x3] }
 0x18b   : > { %v707_v18 = vmul.f32 %v705_v17, %v699_v14 }
 0x18c   : > { %v944_v63 = vsel %vm386_vm8, %v943_v42, %v942_v16  ;;  %v1191_v16 = vrot.slane %v2350_v4, 7 }
 0x18d   : > { %v2352_v23 = vadd.f32 %v707_v18, %v569_v12  ;;  %v2354_v24 = vpop.permute.xlu0 %1199  ;;  %v946_v10 = vadd.f32 %v944_v63, %v936_v61  ;;  %v1063_v12 = vsel %vm365_vm7, %v1062_v58, %v2348_v40  ;;  %v1182_v18 = vsel %vm342_vm6, %v1181_v7, %v2346_v31 }
 0x18e   : > { %v1065_v21 = vadd.f32 %v1063_v12, %v1055_v15  ;;  %v1201_v32 = vrot.slane %v2354_v24, 7  ;;  %v1192_v31 = vsel %vm342_vm6, %v1191_v16, %v2350_v4  ;;  %v1117_v15 = vld [vmem:[#allocation7 + $0x5] ss:$8 sm:$0x3] }
 0x18f   : > { %v1071_v25 = vpop.permute.xlu2 %1070 }
 0x190   : > { %v1072_v8 = vrot.slane %v1071_v25, 7 }
 0x191   : > { %v824_v19 = vpop.permute.xlu1 %823 }
 0x192   : > { %v825_v22 = vrot.slane %v824_v19, 7  ;;  %v1073_v36 = vsel %vm365_vm7, %v1072_v8, %v1071_v25  ;;  %v840_v8 = vld [vmem:[#allocation7 + $0x3] ss:$8 sm:$0x3] }
 0x193   : > { %v1075_v49 = vadd.f32 %v1073_v36, %v1065_v21 }
 0x194   : > { %v826_v62 = vsel %vm407_vm9, %v825_v22, %v824_v19 }
 0x195   : > { %v1081_v30 = vpop.permute.xlu0 %1080  ;;  %v828_v45 = vadd.f32 %v826_v62, %v818_v56 }
 0x196   : > { %v1082_v13 = vrot.slane %v1081_v30, 7 }
 0x197   : > { %v952_v35 = vpop.permute.xlu2 %951 }
 0x198   : > { %v953_v52 = vrot.slane %v952_v35, 7  ;;  %v1083_v6 = vsel %vm386_vm8, %v1082_v13, %v1081_v30  ;;  %v1202_v30 = vsel %vm365_vm7, %v1201_v32, %v2354_v24 }
 0x199   : > { %v2361_v1 = vpop.permute.xlu1 %1209  ;;  %v1085_v59 = vadd.f32 %v1083_v6, %v1075_v49 }
 0x19a   : > { %v954_v53 = vsel %vm386_vm8, %v953_v52, %v952_v35  ;;  %v1184_v35 = vadd.f32 %v1182_v18, %v2342_v57  ;;  %v1211_v25 = vrot.slane %v2361_v1, 7  ;;  %v1256_v18 = vld [vmem:[#allocation7 + $0x6] ss:$8 sm:$0x3] }
 0x19b   : > { %v956_v17 = vadd.f32 %v954_v53, %v946_v10 }
 0x19c   : > { %v1194_v22 = vadd.f32 %v1192_v31, %v1184_v35  ;;  %v1212_v4 = vsel %vm365_vm7, %v1211_v25, %v2361_v1 }
 0x19d   : > { %v962_v51 = vpop.permute.xlu0 %961 }
 0x19e   : > { %v963_v3 = vrot.slane %v962_v51, 7  ;;  %v1204_v28 = vadd.f32 %v1202_v30, %v1194_v22 }
 0x19f   : > { %v834_v41 = vpop.permute.xlu2 %833 }
 0x1a0   : > { %v835_v33 = vrot.slane %v834_v41, 7  ;;  %v964_v14 = vsel %vm407_vm9, %v963_v3, %v962_v51  ;;  %v1214_v62 = vadd.f32 %v1212_v4, %v1204_v28 }
 0x1a1   : > { %v1091_v2 = vpop.permute.xlu1 %1090  ;;  %v966_v20 = vadd.f32 %v964_v14, %v956_v17 }
 0x1a2   : > { %v836_v5 = vsel %vm407_vm9, %v835_v33, %v834_v41  ;;  %v1092_v19 = vrot.slane %v1091_v2, 7 }
 0x1a3   : > { %v838_v11 = vadd.f32 %v836_v5, %v828_v45 }
 0x1a4   : > { %v1093_v39 = vsel %vm386_vm8, %v1092_v19, %v1091_v2 }
 0x1a5   : > { %842 = vrot.lane.b32.xlu0 %v838_v11, %s1752_s18  ;;  %v972_v60 = vpop.permute.xlu0 %971  ;;  %v1095_v44 = vadd.f32 %v1093_v39, %v1085_v59  ;;  %s1757_s18 = smov 46  }
 0x1a6   : > { %v973_v26 = vrot.slane %v972_v60, 7 }
 0x1a7   : > { %v1220_v40 = vpop.permute.xlu2 %1219 }
 0x1a8   : > { %v974_v34 = vsel %vm407_vm9, %v973_v26, %v972_v60  ;;  %v1221_v46 = vrot.slane %v1220_v40, 7 }
 0x1a9   : > { %v976_v38 = vadd.f32 %v974_v34, %v966_v20  ;;  %v1101_v27 = vpop.permute.xlu1 %1100 }
 0x1aa   : > { %v1102_v43 = vrot.slane %v1101_v27, 7  ;;  %v1222_v51 = vsel %vm386_vm8, %v1221_v46, %v1220_v40 }
 0x1ab   : > { %980 = vrot.lane.b32.xlu1 %v976_v38, %s1756_s9  ;;  %v1224_v56 = vadd.f32 %v1222_v51, %v1214_v62 }
 0x1ac   : > { %v1103_v57 = vsel %vm407_vm9, %v1102_v43, %v1101_v27  ;;  %v1270_v27 = vld [vmem:[%s1889_s17] sm:$0xff] }
 0x1ad   : > { %v1111_v47 = vpop.permute.xlu0 %1110  ;;  %v1105_v42 = vadd.f32 %v1103_v57, %v1095_v44 }
 0x1ae   : > { %v1112_v48 = vrot.slane %v1111_v47, 7 }
 0x1af   : > { %v1230_v50 = vpop.permute.xlu2 %1229 }
 0x1b0   : > { %v1113_v37 = vsel %vm407_vm9, %v1112_v48, %v1111_v47  ;;  %v1231_v0 = vrot.slane %v1230_v50, 7 }
 0x1b1   : > { %v1115_v24 = vadd.f32 %v1113_v37, %v1105_v42  ;;  %v1240_v52 = vpop.permute.xlu1 %1239 }
 0x1b2   : > { %v1232_v54 = vsel %vm386_vm8, %v1231_v0, %v1230_v50  ;;  %v1241_v55 = vrot.slane %v1240_v52, 7 }
 0x1b3   : > { %1119 = vrot.lane.b32.xlu2 %v1115_v24, %s1757_s18  ;;  %v1234_v41 = vadd.f32 %v1232_v54, %v1224_v56 }
 0x1b4   : > { %v1242_v1 = vsel %vm407_vm9, %v1241_v55, %v1240_v52 }
 0x1b5   : > { %v1244_v3 = vadd.f32 %v1242_v1, %v1234_v41 }
 0x1b7   : > { %v1250_v58 = vpop.permute.xlu2 %1249 }
 0x1b8   : > { %v1251_v63 = vrot.slane %v1250_v58, 7 }
 0x1ba   : > { %v1252_v33 = vsel %vm407_vm9, %v1251_v63, %v1250_v58 }
 0x1bb   : > { %v1254_v7 = vadd.f32 %v1252_v33, %v1244_v3 }
 0x1bd   : > { %1258 = vrot.lane.b32.xlu0 %v1254_v7, %s1758_s27 }
 0x20d   : > { %v1120_v5 = vpop.permute.xlu2 %1119 }
 0x20e   : > { %v1121_v12 = vrot.slane %v1120_v5, 1 }
 0x210   : > { %v1123_v16 = vsel %vm1122_vm14, %v1120_v5, %v1121_v12 }
 0x211   : > { %v1125_v19 = vmul.f32 %v1123_v16, %v1117_v15 }
 0x217   : > { %v843_v61 = vpop.permute.xlu0 %842 }
 0x218   : > { %v844_v2 = vrot.slane %v843_v61, 1 }
 0x21a   : > { %v845_v53 = vsel %vm386_vm8, %v843_v61, %v844_v2 }
 0x21b   : > { %v847_v11 = vmul.f32 %v845_v53, %v840_v8 }
 0x21d   : > { %v981_v45 = vpop.permute.xlu1 %980  ;;  %v848_v14 = vadd.f32 %v847_v11, %v2352_v23 }
 0x21e   : > { %v982_v29 = vrot.slane %v981_v45, 1 }
 0x220   : > { %v984_v10 = vsel %vm983_vm13, %v981_v45, %v982_v29 }
 0x221   : > { %v986_v13 = vmul.f32 %v984_v10, %v978_v9 }
 0x223   : > { %v987_v17 = vadd.f32 %v986_v13, %v848_v14 }
 0x225   : > { %v1126_v21 = vadd.f32 %v1125_v19, %v987_v17 }
 0x22f   : > { %v1259_v60 = vpop.permute.xlu0 %1258 }
 0x230   : > { %v1260_v36 = vrot.slane %v1259_v60, 1 }
 0x232   : > { %v1262_v26 = vsel %vm1261_vm15, %v1259_v60, %v1260_v36 }
 0x233   : > { %v1264_v20 = vmul.f32 %v1262_v26, %v1256_v18 }
 0x235   : > { %v1265_v40 = vadd.f32 %v1264_v20, %v1126_v21 }
 0x237   : > { %v1266_v32 = vmul.f32 0.5, %v1265_v40 }
 0x239   : > { %1587 = vtanh.f32 %v1266_v32 }
 0x23f   : > { %v1588_v6 = vpop.eup %1587 }
 0x240   : > { %v1268_v34 = vmul.f32 0.5, %v1588_v6 }
 0x242   : > { %v1269_v23 = vadd.f32 0.5, %v1268_v34 }
 0x244   : > { %v1273_v35 = vperm.slane %v1269_v23, 1  ;;  %v1272_v49 = vperm.slane %v1269_v23, 0 }
 0x246   : > { %v1274_v38 = vrot.slane %v1273_v35, 4 }
 0x248   : > { %v1275_v31 = vsel %vm225_vm1, %v1272_v49, %v1274_v38 }
 0x249   : > { %v1277_v25 = vmul.f32 %v1275_v31, %v1270_v27 }
 0x24b   : > { %1278 = vst [vmem:[%s217_s25] sm:$0xff] %v1277_v25 }
 0x24c   : > { %1695 = shalt.err (!%p1692_p11)
}
 0x24d   : > { %1517 = dma.vmem_to_hbm [thread:$0]  (%p1845_p3), %s1294_s26, 128, %s1296_s28, %s1280_s16  }
 0x24e PF: > { %s1307_s8 = sand.u32 1, %s1730_s12   ;;  %p2456_p12 = scmp.ge.s32.totalorder %s1742_s15, 2 }
 0x24f   : > { %s1308_s9 = scalar_lea.sflag [#allocation5], %s1307_s8 }
 0x250   : > { %p1531_p13 = pnand %p2456_p12, %p1814_p6 }
 0x252   : > { %p1532_p0 = pneg %p1531_p13 }
 0x254   : > { %1725 = dma.done.wait (%p1532_p0), %s1308_s9, 128  }
 0x255   : > { %1727 = vsyncadd (%p1532_p0), %s1308_s9, 4294967168  ;;  %p18_p5 = scmp.ge.s32.totalorder %s1835_s30, 4   ;;  %s2457_s12 = smov %s1734_s13 }
 0x256   : > { %s2458_s13 = smov %s1738_s14  ;;  %s2459_s14 = smov %s1851_s7 }
 0x257   : > { %s2460_s15 = smov %s1835_s30  ;;  %20 = sbr.rel (!%p18_p5) target bundleno = 7 (0x7), region = 94 }
 0x25c   :  { %1314 = vsyncpa [#allocation4], 1 }
 0x25d   :  { %1316 = vsyncpa [#allocation4 + $0x1], 1 }
 0x25e   :  { %1317 = vsyncpa [#allocation9], 1 }
 0x25f   :  { %1319 = vsyncpa [#allocation9 + $0x1], 1 }
 0x260   :  { %1320 = vsyncpa [#allocation5], 1 }
 0x261   :  { %1322 = vsyncpa [#allocation5 + $0x1], 1 }
 0x262   :  { %1323 = vsyncpa [#allocation6], 1 }
 0x263   :  { %1325 = vsyncpa [#allocation6 + $0x1], 1 }

</bundles_post_ra>
